<compile_context>
chip_gen: v6e
topology: v6e:2x2x1
jax: 0.10.0
libtpu: 0.0.40
codegen_flags: <defaults>
</compile_context>

<pallas_src>
import functools

import jax
import jax.numpy as jnp
from jax.experimental import pallas as pl
from jax.experimental.pallas import tpu as pltpu


def _round_up(v, m):
    return -(-v // m) * m


def _pad2d(a, rows, cols):
    pr, pc = rows - a.shape[0], cols - a.shape[1]
    if pr or pc:
        a = jnp.pad(a, ((0, pr), (0, pc)))
    return a


def _largest_divisor_tile(n_pad, cap, align=256, min_blocks=1):
    """Largest multiple of `align` that divides n_pad, is <= cap, and leaves
    at least `min_blocks` blocks.  Falls back to n_pad (single block)."""
    best = 0
    d = align
    lim = min(cap, n_pad)
    while d <= lim:
        if n_pad % d == 0 and n_pad // d >= min_blocks:
            best = d
        d += align
    return best if best else n_pad


def _apply_activation(out, activation, negative_slope):
    if activation == "relu":
        return jnp.maximum(out, 0.0)
    if activation == "leaky_relu":
        return jnp.where(out >= 0.0, out, negative_slope * out)
    if activation == "tanh":
        return jnp.tanh(out)
    if activation in ("none", None):
        return out
    raise NotImplementedError(activation)


def _gcn_block_kernel(a_ref, xk_ref, xi_ref, drow_ref, w_ref, b_ref,
                      o_ref, acc_ref, *, activation, negative_slope,
                      compute_dtype):
    k = pl.program_id(1)

    @pl.when(k == 0)
    def _init():
        acc_ref[...] = jnp.zeros_like(acc_ref)

    # A arrives from HBM as int8 (0/1 exact, half the bytes of bf16); upcast on
    # the VPU (which has slack) right before the MXU dot.  f32 accumulation.
    a_t = a_ref[...].astype(compute_dtype)
    x_t = xk_ref[...].astype(compute_dtype)
    acc_ref[...] += jnp.dot(a_t, x_t, preferred_element_type=jnp.float32)

    @pl.when(k == pl.num_programs(1) - 1)
    def _finalize():
        # + self-loop term (exact f32 add), then left D^{-1/2}: agg = A_hat @ x
        agg = (acc_ref[...] + xi_ref[...]) * drow_ref[...]
        # feature transform + bias on the lane-dense (128-padded) F_out axis
        out = jnp.dot(agg.astype(w_ref.dtype), w_ref[...],
                      preferred_element_type=jnp.float32)
        out = out + b_ref[...]
        out = _apply_activation(out, activation, negative_slope)
        o_ref[...] = out.astype(o_ref.dtype)


def gcn_block(x, adj, weight, bias, *, activation=None, negative_slope=0.01,
              add_self_loops=True, normalize=True, improved=False,
              compute_dtype=jnp.bfloat16):
    """Forward pass of GCNBlock (norm=None).

    x      : (N, F_in)   float node features
    adj    : (N, N)      dense adjacency (0/1, no self loops).  Passing it
                         already as int8 avoids one wrapper-side N^2 cast pass.
    weight : (F_in, F_out)   (transpose of PyG's (F_out, F_in) lin.weight)
    bias   : (F_out,)
    """
    n, f_in = x.shape
    f_out = weight.shape[1]

    x = x.astype(jnp.float32)

    # --- fold GCN normalization into per-node scaling (no N x N A_hat) -------
    # Degree: one f32-accumulating pass over adj in its native dtype.
    fill = 2.0 if improved else 1.0
    if normalize:
        deg = jnp.sum(adj, axis=1, dtype=jnp.float32)
        if add_self_loops:
            deg = deg + fill
        s = jnp.where(deg > 0.0, jax.lax.rsqrt(deg), 0.0)
    else:
        s = jnp.ones((n,), jnp.float32)
    x_s = x * s[:, None]                          # right D^{-1/2} folded into x
    # NOTE: matches PyG GCNConv — self loops are only added inside gcn_norm,
    # i.e. they take effect only when normalize=True.
    use_self_loops = add_self_loops and normalize
    x_self = (fill * x_s) if use_self_loops else jnp.zeros_like(x_s)
    d_row = s.reshape(n, 1)                       # left D^{-1/2}, applied in-kernel

    # --- tiling (n_pad decoupled from tk; tiles are divisors of n_pad) -------
    n_pad = _round_up(n, 256)
    tm = _largest_divisor_tile(n_pad, cap=512, min_blocks=2)   # >=2 row blocks for v7x 2-TC
    tk = _largest_divisor_tile(n_pad, cap=4096, min_blocks=1)  # large reduction tile
    f_out_pad = _round_up(f_out, 128)                          # lane-dense out / W / bias

    # Adjacency transported as int8 (exact for 0/1): halves the dominant HBM
    # stream.  pad + cast fuse into one XLA pass (a no-op cast if adj is int8).
    a_p = _pad2d(adj, n_pad, n_pad).astype(jnp.int8)
    # x stays f32 in HBM (N x F_in is tiny vs N^2); cast in-kernel for the dot.
    # F_in deliberately left unpadded (see header comment).
    xk_p = _pad2d(x_s, n_pad, f_in)
    xi_p = _pad2d(x_self, n_pad, f_in)
    d_p = _pad2d(d_row, n_pad, 1)
    w_p = _pad2d(weight.astype(compute_dtype), f_in, f_out_pad)
    b_p = _pad2d(bias.reshape(1, f_out).astype(jnp.float32), 1, f_out_pad)

    kernel = functools.partial(_gcn_block_kernel, activation=activation,
                               negative_slope=negative_slope,
                               compute_dtype=compute_dtype)

    out = pl.pallas_call(
        kernel,
        out_shape=jax.ShapeDtypeStruct((n_pad, f_out_pad), jnp.float32),
        grid=(n_pad // tm, n_pad // tk),               # (rows, reduction) — reduction last
        in_specs=[
            pl.BlockSpec((tm, tk), lambda i, k: (i, k)),           # A tile (int8)
            pl.BlockSpec((tk, f_in), lambda i, k: (k, 0)),         # (D^{-1/2} x) K-tile (f32)
            pl.BlockSpec((tm, f_in), lambda i, k: (i, 0)),         # self-loop row tile (f32)
            pl.BlockSpec((tm, 1), lambda i, k: (i, 0)),            # d_inv_sqrt rows
            pl.BlockSpec((f_in, f_out_pad), lambda i, k: (0, 0)),  # W (padded lanes)
            pl.BlockSpec((1, f_out_pad), lambda i, k: (0, 0)),     # bias (padded lanes)
        ],
        out_specs=pl.BlockSpec((tm, f_out_pad), lambda i, k: (i, 0)),
        scratch_shapes=[pltpu.VMEM((tm, f_in), jnp.float32)],      # A_hat@x accumulator
        compiler_params=pltpu.CompilerParams(
            dimension_semantics=("parallel", "arbitrary")),
    )(a_p, xk_p, xi_p, d_p, w_p, b_p)

    return out[:n, :f_out]


def reference_gcn_block(x, adj, weight, bias, *, activation=None, negative_slope=0.01):
    a = adj.astype(jnp.float32) + jnp.eye(adj.shape[0], dtype=jnp.float32)
    deg = jnp.sum(a, axis=1)
    d = jnp.where(deg > 0, jax.lax.rsqrt(deg), 0.0)
    a = a * d[:, None] * d[None, :]
    out = a @ (x @ weight) + bias[None, :]
    if activation == "relu":
        out = jnp.maximum(out, 0.0)
    elif activation == "leaky_relu":
        out = jnp.where(out >= 0, out, negative_slope * out)
    elif activation == "tanh":
        out = jnp.tanh(out)
    return out


if __name__ == "__main__":
    # GCNBlock(in_features=8, out_features=32, activation="relu", norm=None)
    N, F_IN, F_OUT = 16, 8, 32
    key = jax.random.PRNGKey(0)
    kx, ka, kw = jax.random.split(key, 3)

    x = jax.random.normal(kx, (N, F_IN), dtype=jnp.float32)

    # deterministic random symmetric 0/1 adjacency, no self loops
    a_rand = jax.random.uniform(ka, (N, N))
    adj = (a_rand + a_rand.T > 1.0).astype(jnp.float32)
    adj = adj * (1.0 - jnp.eye(N))
    adj_i8 = adj.astype(jnp.int8)        # compact transport dtype (best practice)

    # glorot-style weight (PyG GCNConv reset_parameters), zero bias
    limit = (6.0 / (F_IN + F_OUT)) ** 0.5
    weight = jax.random.uniform(kw, (F_IN, F_OUT), minval=-limit, maxval=limit,
                                dtype=jnp.float32)
    bias = jnp.zeros((F_OUT,), dtype=jnp.float32)

    ref = reference_gcn_block(x, adj, weight, bias, activation="relu")

    # exact-path check (f32 compute dtype, int8 adjacency is exact)
    out_f32 = jax.block_until_ready(
        gcn_block(x, adj_i8, weight, bias, activation="relu",
                  compute_dtype=jnp.float32))
    assert out_f32.shape == (N, F_OUT)
    assert jnp.allclose(out_f32, ref, atol=1e-4, rtol=1e-4), "f32 path mismatch"

    # default optimized path (int8 A transport, bf16 MXU inputs, f32 accumulation)
    out = jax.block_until_ready(
        gcn_block(x, adj_i8, weight, bias, activation="relu"))
    assert out.shape == (N, F_OUT)
    assert jnp.allclose(out, ref, atol=3e-2, rtol=3e-2), "bf16 path mismatch"

    print("KERNEL_OK")
</pallas_src>

<mosaic_0001>
module attributes {stable_mosaic.version = 11 : i64} {
  func.func @_gcn_block_kernel(%arg0: i32, %arg1: i32, %arg2: memref<256x256xi8, #tpu.memory_space<vmem>>, %arg3: memref<256x8xf32, #tpu.memory_space<vmem>>, %arg4: memref<256x8xf32, #tpu.memory_space<vmem>>, %arg5: memref<256x1xf32, #tpu.memory_space<vmem>>, %arg6: memref<8x128xf32, #tpu.memory_space<vmem>>, %arg7: memref<1x128xf32, #tpu.memory_space<vmem>>, %arg8: memref<256x128xf32, #tpu.memory_space<vmem>>, %arg9: memref<256x8xf32, #tpu.memory_space<vmem>>) attributes {dimension_semantics = [#tpu.dimension_semantics<parallel>, #tpu.dimension_semantics<arbitrary>], iteration_bounds = array<i64: 1, 1>, scalar_prefetch = 0 : i64, scratch_operands = 1 : i64, tpu.core_type = #tpu.core_type<tc>, window_params = [{transform_indices = @transform_0, window_bounds = array<i64: 256, 256>}, {transform_indices = @transform_1, window_bounds = array<i64: 256, 8>}, {transform_indices = @transform_2, window_bounds = array<i64: 256, 8>}, {transform_indices = @transform_3, window_bounds = array<i64: 256, 1>}, {pipeline_mode = #tpu.pipeline_mode<synchronous>, transform_indices = @transform_4, window_bounds = array<i64: 8, 128>}, {pipeline_mode = #tpu.pipeline_mode<synchronous>, transform_indices = @transform_5, window_bounds = array<i64: 1, 128>}, {transform_indices = @transform_6, window_bounds = array<i64: 256, 128>}]} {
    %c0_i32 = arith.constant 0 : i32
    %0 = arith.cmpi eq, %arg1, %c0_i32 : i32
    %1 = arith.extui %0 : i1 to i32
    %c0_i32_0 = arith.constant 0 : i32
    %2 = arith.cmpi ne, %1, %c0_i32_0 : i32
    scf.if %2 {
      %cst_10 = arith.constant 0.000000e+00 : f32
      %13 = vector.broadcast %cst_10 : f32 to vector<256x8xf32>
      %c0_11 = arith.constant 0 : index
      %c0_12 = arith.constant 0 : index
      %14 = vector.load %arg9[%c0_11, %c0_12] : memref<256x8xf32, #tpu.memory_space<vmem>>, vector<256x8xf32>
      tpu.vector_store %arg9[%c0_11, %c0_12], %13 {strides = array<i32>} : memref<256x8xf32, #tpu.memory_space<vmem>>, vector<256x8xf32>,
    } else {
    }
    %c0 = arith.constant 0 : index
    %c0_1 = arith.constant 0 : index
    %3 = vector.load %arg2[%c0, %c0_1] : memref<256x256xi8, #tpu.memory_space<vmem>>, vector<256x256xi8>
    %4 = arith.sitofp %3 : vector<256x256xi8> to vector<256x256xf32>
    %c0_2 = arith.constant 0 : index
    %c0_3 = arith.constant 0 : index
    %5 = vector.load %arg3[%c0_2, %c0_3] : memref<256x8xf32, #tpu.memory_space<vmem>>, vector<256x8xf32>
    %c0_4 = arith.constant 0 : index
    %c0_5 = arith.constant 0 : index
    %6 = vector.load %arg9[%c0_4, %c0_5] : memref<256x8xf32, #tpu.memory_space<vmem>>, vector<256x8xf32>
    %cst = arith.constant dense<0.000000e+00> : vector<256x8xf32>
    %7 = tpu.matmul %4, %5, %cst {dimension_numbers = #tpu.dot_dimension_numbers<[1], [0], [0], [1], [0, 0, 1, 1], [], []>} : vector<256x256xf32>, vector<256x8xf32>, vector<256x8xf32> -> vector<256x8xf32>
    %8 = arith.addf %6, %7 : vector<256x8xf32>
    %c0_6 = arith.constant 0 : index
    %c0_7 = arith.constant 0 : index
    %9 = vector.load %arg9[%c0_6, %c0_7] : memref<256x8xf32, #tpu.memory_space<vmem>>, vector<256x8xf32>
    tpu.vector_store %arg9[%c0_6, %c0_7], %8 {strides = array<i32>} : memref<256x8xf32, #tpu.memory_space<vmem>>, vector<256x8xf32>,
    %c0_i32_8 = arith.constant 0 : i32
    %10 = arith.cmpi eq, %arg1, %c0_i32_8 : i32
    %11 = arith.extui %10 : i1 to i32
    %c0_i32_9 = arith.constant 0 : i32
    %12 = arith.cmpi ne, %11, %c0_i32_9 : i32
    scf.if %12 {
      %c0_10 = arith.constant 0 : index
      %c0_11 = arith.constant 0 : index
      %13 = vector.load %arg9[%c0_10, %c0_11] : memref<256x8xf32, #tpu.memory_space<vmem>>, vector<256x8xf32>
      %c0_12 = arith.constant 0 : index
      %c0_13 = arith.constant 0 : index
      %14 = vector.load %arg4[%c0_12, %c0_13] : memref<256x8xf32, #tpu.memory_space<vmem>>, vector<256x8xf32>
      %15 = arith.addf %13, %14 : vector<256x8xf32>
      %c0_14 = arith.constant 0 : index
      %c0_15 = arith.constant 0 : index
      %16 = vector.load %arg5[%c0_14, %c0_15] : memref<256x1xf32, #tpu.memory_space<vmem>>, vector<256x1xf32>
      %17 = vector.broadcast %16 : vector<256x1xf32> to vector<256x8xf32>
      %18 = arith.mulf %15, %17 : vector<256x8xf32>
      %c0_16 = arith.constant 0 : index
      %c0_17 = arith.constant 0 : index
      %19 = vector.load %arg6[%c0_16, %c0_17] : memref<8x128xf32, #tpu.memory_space<vmem>>, vector<8x128xf32>
      %cst_18 = arith.constant dense<0.000000e+00> : vector<256x128xf32>
      %20 = tpu.matmul %18, %19, %cst_18 {dimension_numbers = #tpu.dot_dimension_numbers<[1], [0], [0], [1], [0, 0, 1, 1], [], []>} : vector<256x8xf32>, vector<8x128xf32>, vector<256x128xf32> -> vector<256x128xf32>
      %c0_19 = arith.constant 0 : index
      %c0_20 = arith.constant 0 : index
      %21 = vector.load %arg7[%c0_19, %c0_20] : memref<1x128xf32, #tpu.memory_space<vmem>>, vector<1x128xf32>
      %22 = vector.broadcast %21 : vector<1x128xf32> to vector<256x128xf32>
      %23 = arith.addf %20, %22 : vector<256x128xf32>
      %cst_21 = arith.constant 0.000000e+00 : f32
      %24 = vector.broadcast %cst_21 : f32 to vector<256x128xf32>
      %25 = arith.maximumf %23, %24 : vector<256x128xf32>
      %c0_22 = arith.constant 0 : index
      %c0_23 = arith.constant 0 : index
      %26 = vector.load %arg8[%c0_22, %c0_23] : memref<256x128xf32, #tpu.memory_space<vmem>>, vector<256x128xf32>
      tpu.vector_store %arg8[%c0_22, %c0_23], %25 {strides = array<i32>} : memref<256x128xf32, #tpu.memory_space<vmem>>, vector<256x128xf32>,
    } else {
    }
    return
  }
  func.func @transform_0(%arg0: i32, %arg1: i32) -> (i32, i32) {
    %c0_i32 = arith.constant 0 : i32
    return %arg0, %arg1 : i32, i32
  }
  func.func @transform_1(%arg0: i32, %arg1: i32) -> (i32, i32) {
    %c0_i32 = arith.constant 0 : i32
    %c0_i32_0 = arith.constant 0 : i32
    return %arg1, %c0_i32 : i32, i32
  }
  func.func @transform_2(%arg0: i32, %arg1: i32) -> (i32, i32) {
    %c0_i32 = arith.constant 0 : i32
    %c0_i32_0 = arith.constant 0 : i32
    return %arg0, %c0_i32 : i32, i32
  }
  func.func @transform_3(%arg0: i32, %arg1: i32) -> (i32, i32) {
    %c0_i32 = arith.constant 0 : i32
    %c0_i32_0 = arith.constant 0 : i32
    return %arg0, %c0_i32 : i32, i32
  }
  func.func @transform_4(%arg0: i32, %arg1: i32) -> (i32, i32) {
    %c0_i32 = arith.constant 0 : i32
    %c0_i32_0 = arith.constant 0 : i32
    %c0_i32_1 = arith.constant 0 : i32
    return %c0_i32, %c0_i32_0 : i32, i32
  }
  func.func @transform_5(%arg0: i32, %arg1: i32) -> (i32, i32) {
    %c0_i32 = arith.constant 0 : i32
    %c0_i32_0 = arith.constant 0 : i32
    %c0_i32_1 = arith.constant 0 : i32
    return %c0_i32, %c0_i32_0 : i32, i32
  }
  func.func @transform_6(%arg0: i32, %arg1: i32) -> (i32, i32) {
    %c0_i32 = arith.constant 0 : i32
    %c0_i32_0 = arith.constant 0 : i32
    return %arg0, %c0_i32 : i32, i32
  }
}

</mosaic_0001>

<bundles_post_ra>
// kernel: tpu_custom_call.1
= control target key start
LH: loop header
LB: loop body
LE: loop exit
PB: predicated region body
PF: predicated region fallthrough
CT: control target
= control target key end

     0   :  { %v1500_v1 = vmov 0.0   ;;  %s2165_s0 = inlined_call_operand.vmem [shape: s8[256,256], index: 0, kind: input, shape index: {}]   ;;  %s2166_s1 = inlined_call_operand.vmem [shape: f32[256,8], index: 1, kind: input, shape index: {}]   ;;  %s2167_s2 = inlined_call_operand.vmem [shape: f32[256,8], index: 2, kind: input, shape index: {}]   ;;  %s2168_s3 = inlined_call_operand.vmem [shape: f32[256,1], index: 3, kind: input, shape index: {}]   ;;  %s2169_s4 = inlined_call_operand.vmem [shape: f32[8,128], index: 4, kind: input, shape index: {}]   ;;  %s2170_s5 = inlined_call_operand.vmem [shape: f32[1,128], index: 5, kind: input, shape index: {}]   ;;  %s2171_s6 = inlined_call_operand.hbm [shape: f32[256,128], index: 6, kind: output, shape index: {}]  }
   0x1   :  { %v220_v0 = vld [vmem:[%s2166_s1 + $0x78] sm:$0xff]  ;;  %269 = vmatprep.subr.mxu0 %v1500_v1  ;;  %v219_v2 = vld [vmem:[%s2166_s1 + $0x70] sm:$0xff]  ;;  %1407 = vmatprep.subr.mxu1 %v1500_v1  ;;  %v218_v3 = vld [vmem:[%s2166_s1 + $0x68] sm:$0xff] }
   0x2   :  { %270 = vmatpush1.msra.mxu0 %v220_v0  ;;  %1439 = vmatpush1.msra.mxu1 %v220_v0  ;;  %v217_v4 = vld [vmem:[%s2166_s1 + $0x60] sm:$0xff]  ;;  %v216_v5 = vld [vmem:[%s2166_s1 + $0x58] sm:$0xff]  ;;  %v215_v6 = vld [vmem:[%s2166_s1 + $0x50] sm:$0xff] }
   0x3   :  { %271 = vmatprep.subr.mxu0 %v1500_v1  ;;  %1408 = vmatprep.subr.mxu1 %v1500_v1  ;;  %v214_v7 = vld [vmem:[%s2166_s1 + $0x48] sm:$0xff]  ;;  %v213_v8 = vld [vmem:[%s2166_s1 + $0x40] sm:$0xff]  ;;  %v212_v9 = vld [vmem:[%s2166_s1 + $0x38] sm:$0xff] }
   0x4   :  { %272 = vmatpush1.msra.mxu0 %v219_v2  ;;  %1440 = vmatpush1.msra.mxu1 %v219_v2  ;;  %v211_v10 = vld [vmem:[%s2166_s1 + $0x30] sm:$0xff]  ;;  %v210_v11 = vld [vmem:[%s2166_s1 + $0x28] sm:$0xff] }
   0x5   :  { %273 = vmatprep.subr.mxu0 %v1500_v1  ;;  %1409 = vmatprep.subr.mxu1 %v1500_v1 }
   0x6   :  { %274 = vmatpush1.msra.mxu0 %v218_v3  ;;  %1441 = vmatpush1.msra.mxu1 %v218_v3 }
   0x7   :  { %275 = vmatprep.subr.mxu0 %v1500_v1  ;;  %1410 = vmatprep.subr.mxu1 %v1500_v1 }
   0x8   :  { %276 = vmatpush1.msra.mxu0 %v217_v4  ;;  %1442 = vmatpush1.msra.mxu1 %v217_v4 }
   0x9   :  { %277 = vmatprep.subr.mxu0 %v1500_v1  ;;  %1411 = vmatprep.subr.mxu1 %v1500_v1 }
   0xa   :  { %278 = vmatpush1.msra.mxu0 %v216_v5  ;;  %1443 = vmatpush1.msra.mxu1 %v216_v5 }
   0xb   :  { %279 = vmatprep.subr.mxu0 %v1500_v1  ;;  %1412 = vmatprep.subr.mxu1 %v1500_v1 }
   0xc   :  { %280 = vmatpush1.msra.mxu0 %v215_v6  ;;  %1444 = vmatpush1.msra.mxu1 %v215_v6 }
   0xd   :  { %281 = vmatprep.subr.mxu0 %v1500_v1  ;;  %1413 = vmatprep.subr.mxu1 %v1500_v1 }
   0xe   :  { %282 = vmatpush1.msra.mxu0 %v214_v7  ;;  %1445 = vmatpush1.msra.mxu1 %v214_v7 }
   0xf   :  { %283 = vmatprep.subr.mxu0 %v1500_v1  ;;  %1414 = vmatprep.subr.mxu1 %v1500_v1 }
  0x10   :  { %284 = vmatpush1.msra.mxu0 %v213_v8  ;;  %1446 = vmatpush1.msra.mxu1 %v213_v8 }
  0x11   :  { %285 = vmatprep.subr.mxu0 %v1500_v1  ;;  %1415 = vmatprep.subr.mxu1 %v1500_v1 }
  0x12   :  { %286 = vmatpush1.msra.mxu0 %v212_v9  ;;  %1447 = vmatpush1.msra.mxu1 %v212_v9 }
  0x13   :  { %287 = vmatprep.subr.mxu0 %v1500_v1  ;;  %1416 = vmatprep.subr.mxu1 %v1500_v1 }
  0x14   :  { %11 = vsyncpa [#allocation4], 0  ;;  %288 = vmatpush1.msra.mxu0 %v211_v10  ;;  %1448 = vmatpush1.msra.mxu1 %v211_v10  ;;  %v209_v12 = vld [vmem:[%s2166_s1 + $0x20] sm:$0xff]  ;;  %v208_v13 = vld [vmem:[%s2166_s1 + $0x18] sm:$0xff]  ;;  %v1501_v61 = vmov 0   ;;  %vm28_vm0 = vcmask 64512  }
  0x15   :  { %289 = vmatprep.subr.mxu0 %v1500_v1  ;;  %1417 = vmatprep.subr.mxu1 %v1500_v1  ;;  %v207_v14 = vld [vmem:[%s2166_s1 + $0x10] sm:$0xff]  ;;  %v206_v15 = vld [vmem:[%s2166_s1 + $0x8] sm:$0xff]  ;;  %v205_v16 = vld [vmem:[%s2166_s1] sm:$0xff]  ;;  %29 = vst.msk [vmem:[#allocation2] sm:$0xff] %vm28_vm0, %v1500_v1 }
  0x16   :  { %290 = vmatpush1.msra.mxu0 %v210_v11  ;;  %1449 = vmatpush1.msra.mxu1 %v210_v11  ;;  %v236_v17 = vld [vmem:[%s2166_s1 + $0xf8] sm:$0xff]  ;;  %v235_v18 = vld [vmem:[%s2166_s1 + $0xf0] sm:$0xff]  ;;  %v1631_v19 = vld [vmem:[%s2165_s0 + $0x8] sm:$0xff]  ;;  %30 = vst.msk [vmem:[#allocation2 + $0x8] sm:$0xff] %vm28_vm0, %v1500_v1 }
  0x17   :  { %291 = vmatprep.subr.mxu0 %v1500_v1  ;;  %1418 = vmatprep.subr.mxu1 %v1500_v1  ;;  %v234_v20 = vld [vmem:[%s2166_s1 + $0xe8] sm:$0xff]  ;;  %v233_v21 = vld [vmem:[%s2166_s1 + $0xe0] sm:$0xff]  ;;  %v78_v22 = vunpack.c.0.s8 %v1631_v19  ;;  %v232_v23 = vld [vmem:[%s2166_s1 + $0xd8] sm:$0xff]  ;;  %v80_v38 = vunpack.c.1.s8 %v1631_v19  ;;  %v82_v47 = vunpack.c.2.s8 %v1631_v19  ;;  %v84_v57 = vunpack.c.3.s8 %v1631_v19  ;;  %31 = vst.msk [vmem:[#allocation2 + $0x10] sm:$0xff] %vm28_vm0, %v1500_v1 }
  0x18   :  { %292 = vmatpush1.msra.mxu0 %v209_v12  ;;  %1450 = vmatpush1.msra.mxu1 %v209_v12  ;;  %v231_v24 = vld [vmem:[%s2166_s1 + $0xd0] sm:$0xff]  ;;  %v230_v26 = vld [vmem:[%s2166_s1 + $0xc8] sm:$0xff]  ;;  %v229_v27 = vld [vmem:[%s2166_s1 + $0xc0] sm:$0xff]  ;;  %32 = vst.msk [vmem:[#allocation2 + $0x18] sm:$0xff] %vm28_vm0, %v1500_v1 }
  0x19   :  { %293 = vmatprep.subr.mxu0 %v1500_v1  ;;  %1419 = vmatprep.subr.mxu1 %v1500_v1  ;;  %v142_v25 = vcvt.s32.f32 %v78_v22  ;;  %v228_v28 = vld [vmem:[%s2166_s1 + $0xb8] sm:$0xff]  ;;  %v227_v29 = vld [vmem:[%s2166_s1 + $0xb0] sm:$0xff]  ;;  %v226_v30 = vld [vmem:[%s2166_s1 + $0xa8] sm:$0xff]  ;;  %v144_v46 = vcvt.s32.f32 %v80_v38  ;;  %v146_v56 = vcvt.s32.f32 %v82_v47  ;;  %33 = vst.msk [vmem:[#allocation2 + $0x20] sm:$0xff] %vm28_vm0, %v1500_v1  ;;  %v148_v6 = vcvt.s32.f32 %v84_v57 }
  0x1a   :  { %294 = vmatpush1.msra.mxu0 %v208_v13  ;;  %1451 = vmatpush1.msra.mxu1 %v208_v13  ;;  %v225_v31 = vld [vmem:[%s2166_s1 + $0xa0] sm:$0xff]  ;;  %v224_v33 = vld [vmem:[%s2166_s1 + $0x98] sm:$0xff]  ;;  %v1696_v34 = vld [vmem:[%s2165_s0 + $0x68] sm:$0xff]  ;;  %34 = vst.msk [vmem:[#allocation2 + $0x28] sm:$0xff] %vm28_vm0, %v1500_v1 }
  0x1b   :  { %295 = vmatprep.subr.mxu0 %v1500_v1  ;;  %1420 = vmatprep.subr.mxu1 %v1500_v1  ;;  %v1686_v32 = vld [vmem:[%s2165_s0] sm:$0xff]  ;;  %v223_v36 = vld [vmem:[%s2166_s1 + $0x90] sm:$0xff]  ;;  %v126_v39 = vunpack.c.0.s8 %v1696_v34  ;;  %v222_v40 = vld [vmem:[%s2166_s1 + $0x88] sm:$0xff]  ;;  %v128_v42 = vunpack.c.1.s8 %v1696_v34  ;;  %v130_v52 = vunpack.c.2.s8 %v1696_v34  ;;  %v132_v0 = vunpack.c.3.s8 %v1696_v34  ;;  %35 = vst.msk [vmem:[#allocation2 + $0x30] sm:$0xff] %vm28_vm0, %v1500_v1 }
  0x1c   :  { %296 = vmatpush1.msra.mxu0 %v207_v14  ;;  %1452 = vmatpush1.msra.mxu1 %v207_v14  ;;  %v1702_v35 = vld [vmem:[%s2165_s0 + $0x60] sm:$0xff]  ;;  %v77_v37 = vunpack.c.0.s8 %v1686_v32  ;;  %v79_v45 = vunpack.c.1.s8 %v1686_v32  ;;  %v81_v54 = vunpack.c.2.s8 %v1686_v32  ;;  %v1738_v58 = vld [vmem:[%s2165_s0 + $0x18] sm:$0xff]  ;;  %v660_v62 = vld [vmem:[%s2168_s3 + $0x10] sm:$0xff]  ;;  %36 = vst.msk [vmem:[#allocation2 + $0x38] sm:$0xff] %vm28_vm0, %v1500_v1  ;;  %v83_v3 = vunpack.c.3.s8 %v1686_v32 }
  0x1d   :  { %297 = vmatprep.subr.mxu0 %v1500_v1  ;;  %1421 = vmatprep.subr.mxu1 %v1500_v1  ;;  %v125_v41 = vunpack.c.0.s8 %v1702_v35  ;;  %v221_v43 = vld [vmem:[%s2166_s1 + $0x80] sm:$0xff]  ;;  %v190_v48 = vcvt.s32.f32 %v126_v39  ;;  %v127_v50 = vunpack.c.1.s8 %v1702_v35  ;;  %v192_v51 = vcvt.s32.f32 %v128_v42  ;;  %37 = vst.msk [vmem:[#allocation2 + $0x40] sm:$0xff] %vm28_vm0, %v1500_v1  ;;  %38 = vst.msk [vmem:[#allocation2 + $0x48] sm:$0xff] %vm28_vm0, %v1500_v1  ;;  %v1813_v4 = vld [vmem:[%s2165_s0 + $0x78] sm:$0xff] }
  0x1e   :  { %298 = vmatpush1.msra.mxu0 %v206_v15  ;;  %1453 = vmatpush1.msra.mxu1 %v206_v15  ;;  %v141_v44 = vcvt.s32.f32 %v77_v37  ;;  %v143_v53 = vcvt.s32.f32 %v79_v45  ;;  %v658_v55 = vld [vmem:[%s2168_s3] sm:$0xff]  ;;  %v129_v60 = vunpack.c.2.s8 %v1702_v35  ;;  %v194_v63 = vcvt.s32.f32 %v130_v52  ;;  %39 = vst.msk [vmem:[#allocation2 + $0x50] sm:$0xff] %vm28_vm0, %v1500_v1  ;;  %40 = vst.msk [vmem:[#allocation2 + $0x58] sm:$0xff] %vm28_vm0, %v1500_v1  ;;  %v659_v5 = vld [vmem:[%s2168_s3 + $0x8] sm:$0xff] }
  0x1f   :  { %299 = vmatprep.subr.mxu0 %v1500_v1  ;;  %1422 = vmatprep.subr.mxu1 %v1500_v1  ;;  %v189_v49 = vcvt.s32.f32 %v125_v41  ;;  %v191_v59 = vcvt.s32.f32 %v127_v50  ;;  %41 = vst.msk [vmem:[#allocation2 + $0x60] sm:$0xff] %vm28_vm0, %v1500_v1  ;;  %42 = vst.msk [vmem:[#allocation2 + $0x68] sm:$0xff] %vm28_vm0, %v1500_v1  ;;  %v145_v2 = vcvt.s32.f32 %v81_v54  ;;  %v86_v7 = vunpack.c.0.s8 %v1738_v58  ;;  %v661_v10 = vld [vmem:[%s2168_s3 + $0x18] sm:$0xff]  ;;  %v1832_v13 = vld [vmem:[%s2165_s0 + $0x70] sm:$0xff] }
  0x20   :  { %300 = vmatpush1.msra.mxu0 %v205_v16  ;;  %1454 = vmatpush1.msra.mxu1 %v205_v16  ;;  %43 = vst.msk [vmem:[#allocation2 + $0x70] sm:$0xff] %vm28_vm0, %v1500_v1  ;;  %44 = vst.msk [vmem:[#allocation2 + $0x78] sm:$0xff] %vm28_vm0, %v1500_v1  ;;  %v193_v8 = vcvt.s32.f32 %v129_v60  ;;  %v131_v9 = vunpack.c.3.s8 %v1702_v35  ;;  %v196_v11 = vcvt.s32.f32 %v132_v0  ;;  %v134_v12 = vunpack.c.0.s8 %v1813_v4  ;;  %v662_v16 = vld [vmem:[%s2168_s3 + $0x20] sm:$0xff]  ;;  %v1862_v39 = vld [vmem:[%s2165_s0 + $0x28] sm:$0xff] }
  0x21   :  { %301 = vmatprep.subr.mxu0 %v1500_v1  ;;  %1423 = vmatprep.subr.mxu1 %v1500_v1  ;;  %45 = vst.msk [vmem:[#allocation2 + $0x80] sm:$0xff] %vm28_vm0, %v1500_v1  ;;  %46 = vst.msk [vmem:[#allocation2 + $0x88] sm:$0xff] %vm28_vm0, %v1500_v1  ;;  %v147_v14 = vcvt.s32.f32 %v83_v3  ;;  %v92_v38 = vunpack.c.3.s8 %v1738_v58  ;;  %v137_v41 = vunpack.c.2.s8 %v1832_v13  ;;  %v667_v42 = vld [vmem:[%s2168_s3 + $0x48] sm:$0xff]  ;;  %v668_v47 = vld [vmem:[%s2168_s3 + $0x50] sm:$0xff]  ;;  %v139_v52 = vunpack.c.3.s8 %v1832_v13 }
  0x22   :  { %302 = vmatpush2.msra.mxu0 %v236_v17  ;;  %1455 = vmatpush2.msra.mxu1 %v236_v17  ;;  %47 = vst.msk [vmem:[#allocation2 + $0x90] sm:$0xff] %vm28_vm0, %v1500_v1  ;;  %48 = vst.msk [vmem:[#allocation2 + $0x98] sm:$0xff] %vm28_vm0, %v1500_v1  ;;  %v150_v17 = vcvt.s32.f32 %v86_v7  ;;  %v195_v19 = vcvt.s32.f32 %v131_v9  ;;  %v198_v22 = vcvt.s32.f32 %v134_v12  ;;  %v65_v50 = vld [vmem:[%s2165_s0 + $0x20] sm:$0xff]  ;;  %v672_v0 = vld [vmem:[%s2168_s3 + $0x70] sm:$0xff]  ;;  %v98_v3 = vunpack.c.2.s8 %v1862_v39 }
  0x23   :  { %303 = vmatprep.subr.mxu0 %v1500_v1  ;;  %1424 = vmatprep.subr.mxu1 %v1500_v1  ;;  %49 = vst.msk [vmem:[#allocation2 + $0xa0] sm:$0xff] %vm28_vm0, %v1500_v1  ;;  %50 = vst.msk [vmem:[#allocation2 + $0xa8] sm:$0xff] %vm28_vm0, %v1500_v1  ;;  %v670_v57 = vld [vmem:[%s2168_s3 + $0x60] sm:$0xff]  ;;  %v203_v60 = vcvt.s32.f32 %v139_v52  ;;  %v68_v9 = vld [vmem:[%s2165_s0 + $0x38] sm:$0xff]  ;;  %v99_v12 = vunpack.c.3.s8 %v65_v50 }
  0x24   :  { %304 = vmatpush2.msra.mxu0 %v235_v18  ;;  %1456 = vmatpush2.msra.mxu1 %v235_v18  ;;  %51 = vst.msk [vmem:[#allocation2 + $0xb0] sm:$0xff] %vm28_vm0, %v1500_v1  ;;  %52 = vst.msk [vmem:[#allocation2 + $0xb8] sm:$0xff] %vm28_vm0, %v1500_v1  ;;  %v88_v18 = vunpack.c.1.s8 %v1738_v58  ;;  %v674_v7 = vld [vmem:[%s2168_s3 + $0x80] sm:$0xff]  ;;  %v688_v52 = vld [vmem:[%s2168_s3 + $0xf0] sm:$0xff] }
  0x25   :  { %305 = vmatprep.subr.mxu0 %v1500_v1  ;;  %1425 = vmatprep.subr.mxu1 %v1500_v1  ;;  %53 = vst.msk [vmem:[#allocation2 + $0xc0] sm:$0xff] %vm28_vm0, %v1500_v1  ;;  %54 = vst.msk [vmem:[#allocation2 + $0xc8] sm:$0xff] %vm28_vm0, %v1500_v1 }
  0x26   :  { %306 = vmatpush2.msra.mxu0 %v234_v20  ;;  %1457 = vmatpush2.msra.mxu1 %v234_v20  ;;  %55 = vst.msk [vmem:[#allocation2 + $0xd0] sm:$0xff] %vm28_vm0, %v1500_v1  ;;  %56 = vst.msk [vmem:[#allocation2 + $0xd8] sm:$0xff] %vm28_vm0, %v1500_v1  ;;  %v133_v20 = vunpack.c.0.s8 %v1832_v13 }
  0x27   :  { %307 = vmatprep.subr.mxu0 %v1500_v1  ;;  %1426 = vmatprep.subr.mxu1 %v1500_v1  ;;  %57 = vst.msk [vmem:[#allocation2 + $0xe0] sm:$0xff] %vm28_vm0, %v1500_v1  ;;  %58 = vst.msk [vmem:[#allocation2 + $0xe8] sm:$0xff] %vm28_vm0, %v1500_v1 }
  0x28   :  { %308 = vmatpush2.msra.mxu0 %v233_v21  ;;  %1458 = vmatpush2.msra.mxu1 %v233_v21  ;;  %59 = vst.msk [vmem:[#allocation2 + $0xf0] sm:$0xff] %vm28_vm0, %v1500_v1  ;;  %60 = vst.msk [vmem:[#allocation2 + $0xf8] sm:$0xff] %vm28_vm0, %v1500_v1  ;;  %v663_v21 = vld [vmem:[%s2168_s3 + $0x28] sm:$0xff] }
  0x29   :  { %309 = vmatprep.subr.mxu0 %v1500_v1  ;;  %1427 = vmatprep.subr.mxu1 %v1500_v1 }
  0x2a   :  { %310 = vmatpush2.msra.mxu0 %v232_v23  ;;  %1459 = vmatpush2.msra.mxu1 %v232_v23  ;;  %v136_v23 = vunpack.c.1.s8 %v1813_v4 }
  0x2b   :  { %311 = vmatprep.subr.mxu0 %v1500_v1  ;;  %1428 = vmatprep.subr.mxu1 %v1500_v1 }
  0x2c   :  { %312 = vmatpush2.msra.mxu0 %v231_v24  ;;  %1460 = vmatpush2.msra.mxu1 %v231_v24  ;;  %v200_v32 = vcvt.s32.f32 %v136_v23  ;;  %v679_v23 = vld [vmem:[%s2168_s3 + $0xa8] sm:$0xff] }
  0x2d   :  { %313 = vmatprep.subr.mxu0 %v1500_v1  ;;  %333 = vmatprep.mubr.f32.mxu0 %v142_v25 }
  0x2e   :  { %314 = vmatpush2.msra.mxu0 %v230_v26  ;;  %1429 = vmatprep.subr.mxu1 %v1500_v1 }
  0x2f   :  { %315 = vmatprep.subr.mxu0 %v1500_v1  ;;  %1461 = vmatpush2.msra.mxu1 %v230_v26  ;;  %v664_v26 = vld [vmem:[%s2168_s3 + $0x30] sm:$0xff] }
  0x30   :  { %316 = vmatpush2.msra.mxu0 %v229_v27  ;;  %1430 = vmatprep.subr.mxu1 %v1500_v1 }
  0x31   :  { %317 = vmatprep.subr.mxu0 %v1500_v1  ;;  %1462 = vmatpush2.msra.mxu1 %v229_v27  ;;  %v152_v27 = vcvt.s32.f32 %v88_v18  ;;  %v163_v18 = vcvt.s32.f32 %v99_v12  ;;  %v882_v12 = vld [vmem:[%s2169_s4] sm:$0xff] }
  0x32   :  { %318 = vmatpush2.msra.mxu0 %v228_v28  ;;  %1431 = vmatprep.subr.mxu1 %v1500_v1 }
  0x33   :  { %319 = vmatprep.subr.mxu0 %v1500_v1  ;;  %1463 = vmatpush2.msra.mxu1 %v228_v28  ;;  %v90_v28 = vunpack.c.2.s8 %v1738_v58 }
  0x34   :  { %320 = vmatpush2.msra.mxu0 %v227_v29  ;;  %1432 = vmatprep.subr.mxu1 %v1500_v1 }
  0x35   :  { %321 = vmatprep.subr.mxu0 %v1500_v1  ;;  %1464 = vmatpush2.msra.mxu1 %v227_v29  ;;  %v197_v29 = vcvt.s32.f32 %v133_v20  ;;  %v154_v37 = vcvt.s32.f32 %v90_v28  ;;  %v678_v20 = vld [vmem:[%s2168_s3 + $0xa0] sm:$0xff]  ;;  %v106_v28 = vunpack.c.2.s8 %v68_v9 }
  0x36   :  { %322 = vmatpush2.msra.mxu0 %v226_v30  ;;  %1433 = vmatprep.subr.mxu1 %v1500_v1 }
  0x37   :  { %323 = vmatprep.subr.mxu0 %v1500_v1  ;;  %1465 = vmatpush2.msra.mxu1 %v226_v30  ;;  %v135_v30 = vunpack.c.1.s8 %v1832_v13  ;;  %v676_v13 = vld [vmem:[%s2168_s3 + $0x90] sm:$0xff] }
  0x38   :  { %324 = vmatpush2.msra.mxu0 %v225_v31  ;;  %1434 = vmatprep.subr.mxu1 %v1500_v1 }
  0x39   :  { %325 = vmatprep.subr.mxu0 %v1500_v1  ;;  %1466 = vmatpush2.msra.mxu1 %v225_v31  ;;  %v665_v31 = vld [vmem:[%s2168_s3 + $0x38] sm:$0xff] }
  0x3a   :  { %326 = vmatpush2.msra.mxu0 %v224_v33  ;;  %1435 = vmatprep.subr.mxu1 %v1500_v1 }
  0x3b   :  { %327 = vmatprep.subr.mxu0 %v1500_v1  ;;  %1467 = vmatpush2.msra.mxu1 %v224_v33  ;;  %v138_v33 = vunpack.c.2.s8 %v1813_v4 }
  0x3c   :  { %328 = vmatpush2.msra.mxu0 %v223_v36  ;;  %1436 = vmatprep.subr.mxu1 %v1500_v1 }
  0x3d   :  { %329 = vmatprep.subr.mxu0 %v1500_v1  ;;  %1468 = vmatpush2.msra.mxu1 %v223_v36  ;;  %v666_v36 = vld [vmem:[%s2168_s3 + $0x40] sm:$0xff] }
  0x3e   :  { %330 = vmatpush2.msra.mxu0 %v222_v40  ;;  %1437 = vmatprep.subr.mxu1 %v1500_v1 }
  0x3f   :  { %331 = vmatprep.subr.mxu0 %v1500_v1  ;;  %1469 = vmatpush2.msra.mxu1 %v222_v40  ;;  %v199_v40 = vcvt.s32.f32 %v135_v30 }
  0x40   :  { %332 = vmatpush2.msra.mxu0 %v221_v43  ;;  %1438 = vmatprep.subr.mxu1 %v1500_v1  ;;  %v1822_v1 = vld [vmem:[%s2165_s0 + $0x10] sm:$0xff] }
  0x41   :  { %334 = vmatmul.mubr.f32.vlgmr.msra.gmra.mxu0 %v141_v44  ;;  %1470 = vmatpush2.msra.mxu1 %v221_v43  ;;  %v85_v15 = vunpack.c.0.s8 %v1822_v1  ;;  %v87_v25 = vunpack.c.1.s8 %v1822_v1  ;;  %v89_v35 = vunpack.c.2.s8 %v1822_v1  ;;  %v202_v43 = vcvt.s32.f32 %v138_v33 }
  0x42   :  { %338 = vmatprep.mubr.f32.mxu0 %v144_v46  ;;  %453 = vmatprep.mubr.f32.mxu1 %v190_v48  ;;  %v140_v44 = vunpack.c.3.s8 %v1813_v4  ;;  %v91_v46 = vunpack.c.3.s8 %v1822_v1  ;;  %v156_v48 = vcvt.s32.f32 %v92_v38  ;;  %v673_v4 = vld [vmem:[%s2168_s3 + $0x78] sm:$0xff]  ;;  %v162_v1 = vcvt.s32.f32 %v98_v3 }
  0x43   :  { %454 = vmatmul.mubr.f32.vlgmr.msra.gmra.mxu1 %v189_v49  ;;  %1476 = vset.pattern.permute.xlu0 %v1501_v61  ;;  %v149_v24 = vcvt.s32.f32 %v85_v15  ;;  %v151_v34 = vcvt.s32.f32 %v87_v25  ;;  %v153_v45 = vcvt.s32.f32 %v89_v35  ;;  %v94_v49 = vunpack.c.0.s8 %v1862_v39  ;;  %v70_v35 = vld [vmem:[%s2165_s0 + $0x48] sm:$0xff] }
  0x44   :  { %458 = vmatprep.mubr.f32.mxu1 %v192_v51  ;;  %692 = vperm.xlu0 %1476, %v658_v55   ;;  %v201_v51 = vcvt.s32.f32 %v137_v41  ;;  %v204_v54 = vcvt.s32.f32 %v140_v44  ;;  %v155_v55 = vcvt.s32.f32 %v91_v46  ;;  %v102_v15 = vunpack.c.0.s8 %v68_v9  ;;  %v686_v46 = vld [vmem:[%s2168_s3 + $0xe0] sm:$0xff] }
  0x45   :  { %339 = vmatmul.mubr.f32.gmra.mxu0 %v143_v53  ;;  %1477 = vset.pattern.permute.xlu1 %v1501_v61  ;;  %v669_v53 = vld [vmem:[%s2168_s3 + $0x58] sm:$0xff]  ;;  %v158_v58 = vcvt.s32.f32 %v94_v49  ;;  %v671_v61 = vld [vmem:[%s2168_s3 + $0x68] sm:$0xff]  ;;  %v170_v33 = vcvt.s32.f32 %v106_v28  ;;  %v110_v41 = vunpack.c.0.s8 %v70_v35 }
  0x46   :  { %343 = vmatprep.mubr.f32.mxu0 %v146_v56  ;;  %702 = vperm.xlu1 %1477, %v660_v62   ;;  %v93_v56 = vunpack.c.0.s8 %v65_v50  ;;  %v687_v49 = vld [vmem:[%s2168_s3 + $0xe8] sm:$0xff] }
  0x47   :  { %459 = vmatmul.mubr.f32.gmra.mxu1 %v191_v59  ;;  %v96_v59 = vunpack.c.1.s8 %v1862_v39  ;;  %1357 = vmatprep.subr.mxu1 %v882_v12 }
  0x48   :  { %463 = vmatprep.mubr.f32.mxu1 %v194_v63  ;;  %697 = vperm.xlu0 %1476, %v659_v5   ;;  %v157_v62 = vcvt.s32.f32 %v93_v56  ;;  %v95_v63 = vunpack.c.1.s8 %v65_v50 }
  0x49   :  { %344 = vmatmul.mubr.f32.gmra.mxu0 %v145_v2  ;;  %v160_v2 = vcvt.s32.f32 %v96_v59  ;;  %v116_v59 = vunpack.c.3.s8 %v70_v35  ;;  %1358 = vmatpush3.msra.mxu1 %v882_v12  ;;  %v266_v12 = vld [vmem:[#allocation2 + $0xe8] sm:$0xff] }
  0x4a   :  { %348 = vmatprep.mubr.f32.mxu0 %v148_v6  ;;  %707 = vperm.xlu1 %1477, %v661_v10   ;;  %v159_v5 = vcvt.s32.f32 %v95_v63  ;;  %v97_v6 = vunpack.c.2.s8 %v65_v50  ;;  %v675_v10 = vld [vmem:[%s2168_s3 + $0x88] sm:$0xff] }
  0x4b   :  { %464 = vmatmul.mubr.f32.gmra.mxu1 %v193_v8  ;;  %v100_v8 = vunpack.c.3.s8 %v1862_v39  ;;  %v684_v39 = vld [vmem:[%s2168_s3 + $0xd0] sm:$0xff]  ;;  %v180_v63 = vcvt.s32.f32 %v116_v59 }
  0x4c   :  { %468 = vmatprep.mubr.f32.mxu1 %v196_v11  ;;  %712 = vperm.xlu0 %1476, %v662_v16   ;;  %v161_v11 = vcvt.s32.f32 %v97_v6  ;;  %v67_v16 = vld [vmem:[%s2165_s0 + $0x30] sm:$0xff] }
  0x4d   :  { %349 = vmatmul.mubr.f32.gmra.mxu0 %v147_v14  ;;  %v164_v14 = vcvt.s32.f32 %v100_v8  ;;  %v103_v25 = vunpack.c.1.s8 %v67_v16  ;;  %v107_v38 = vunpack.c.3.s8 %v67_v16 }
  0x4e   :  { %353 = vmatprep.mubr.f32.mxu0 %v150_v17  ;;  %717 = vperm.xlu1 %1477, %v663_v21   ;;  %v677_v17 = vld [vmem:[%s2168_s3 + $0x98] sm:$0xff]  ;;  %v166_v21 = vcvt.s32.f32 %v102_v15 }
  0x4f   :  { %469 = vmatmul.mubr.f32.gmra.mxu1 %v195_v19  ;;  %v101_v19 = vunpack.c.0.s8 %v67_v16  ;;  %v167_v30 = vcvt.s32.f32 %v103_v25  ;;  %v171_v44 = vcvt.s32.f32 %v107_v38  ;;  %v263_v38 = vld [vmem:[#allocation2 + $0xd0] sm:$0xff] }
  0x50   :  { %473 = vmatprep.mubr.f32.mxu1 %v198_v22  ;;  %722 = vperm.xlu0 %1476, %v664_v26   ;;  %v104_v22 = vunpack.c.1.s8 %v68_v9  ;;  %v680_v26 = vld [vmem:[%s2168_s3 + $0xb0] sm:$0xff] }
  0x51   :  { %354 = vmatmul.mubr.f32.gmra.mxu0 %v149_v24  ;;  %v165_v24 = vcvt.s32.f32 %v101_v19  ;;  %v237_v19 = vld [vmem:[#allocation2] sm:$0xff] }
  0x52   :  { %358 = vmatprep.mubr.f32.mxu0 %v152_v27  ;;  %727 = vperm.xlu1 %1477, %v665_v31   ;;  %v168_v27 = vcvt.s32.f32 %v104_v22  ;;  %v105_v31 = vunpack.c.2.s8 %v67_v16 }
  0x53   :  { %474 = vmatmul.mubr.f32.gmra.mxu1 %v197_v29  ;;  %v681_v29 = vld [vmem:[%s2168_s3 + $0xb8] sm:$0xff] }
  0x54   :  { %478 = vmatprep.mubr.f32.mxu1 %v200_v32  ;;  %732 = vperm.xlu0 %1476, %v666_v36   ;;  %v682_v32 = vld [vmem:[%s2168_s3 + $0xc0] sm:$0xff]  ;;  %v683_v36 = vld [vmem:[%s2168_s3 + $0xc8] sm:$0xff] }
  0x55   :  { %359 = vmatmul.mubr.f32.gmra.mxu0 %v151_v34  ;;  %v108_v34 = vunpack.c.3.s8 %v68_v9 }
  0x56   :  { %363 = vmatprep.mubr.f32.mxu0 %v154_v37  ;;  %737 = vperm.xlu1 %1477, %v667_v42   ;;  %v169_v37 = vcvt.s32.f32 %v105_v31  ;;  %v69_v42 = vld [vmem:[%s2165_s0 + $0x40] sm:$0xff] }
  0x57   :  { %479 = vmatmul.mubr.f32.gmra.mxu1 %v199_v40  ;;  %v172_v40 = vcvt.s32.f32 %v108_v34 }
  0x58   :  { %483 = vmatprep.mubr.f32.mxu1 %v202_v43  ;;  %742 = vperm.xlu0 %1476, %v668_v47   ;;  %v685_v43 = vld [vmem:[%s2168_s3 + $0xd8] sm:$0xff]  ;;  %v174_v47 = vcvt.s32.f32 %v110_v41 }
  0x59   :  { %364 = vmatmul.mubr.f32.gmra.mxu0 %v153_v45  ;;  %v109_v45 = vunpack.c.0.s8 %v69_v42 }
  0x5a   :  { %368 = vmatprep.mubr.f32.mxu0 %v156_v48  ;;  %747 = vperm.xlu1 %1477, %v669_v53   ;;  %v112_v48 = vunpack.c.1.s8 %v70_v35 }
  0x5b   :  { %484 = vmatmul.mubr.f32.gmra.mxu1 %v201_v51  ;;  %v173_v50 = vcvt.s32.f32 %v109_v45  ;;  %v111_v51 = vunpack.c.1.s8 %v69_v42 }
  0x5c   :  { %488 = vmatprep.mubr.f32.mxu1 %v204_v54  ;;  %752 = vperm.xlu0 %1476, %v670_v57   ;;  %v176_v53 = vcvt.s32.f32 %v112_v48  ;;  %v114_v54 = vunpack.c.2.s8 %v70_v35  ;;  %v113_v57 = vunpack.c.2.s8 %v69_v42  ;;  %v595_v48 = vld [vmem:[%s2167_s2 + $0x8] sm:$0xff] }
  0x5d   :  { %369 = vmatmul.mubr.f32.gmra.mxu0 %v155_v55  ;;  %v689_v55 = vld [vmem:[%s2168_s3 + $0xf8] sm:$0xff]  ;;  %v175_v56 = vcvt.s32.f32 %v111_v51 }
  0x5e   :  { %373 = vmatprep.mubr.f32.mxu0 %v158_v58  ;;  %757 = vperm.xlu1 %1477, %v671_v61   ;;  %v178_v58 = vcvt.s32.f32 %v114_v54  ;;  %v177_v61 = vcvt.s32.f32 %v113_v57  ;;  %v241_v54 = vld [vmem:[#allocation2 + $0x20] sm:$0xff] }
  0x5f   :  { %489 = vmatmul.mubr.f32.gmra.mxu1 %v203_v60  ;;  %v72_v60 = vld [vmem:[%s2165_s0 + $0x58] sm:$0xff] }
  0x60   :  { %762 = vperm.xlu0 %1476, %v672_v0   ;;  %v118_v0 = vunpack.c.0.s8 %v72_v60  ;;  %v120_v6 = vunpack.c.1.s8 %v72_v60  ;;  %v122_v9 = vunpack.c.2.s8 %v72_v60 }
  0x61   :  { %374 = vmatmul.mubr.f32.gmra.mxu0 %v157_v62  ;;  %v115_v62 = vunpack.c.3.s8 %v69_v42  ;;  %v240_v42 = vld [vmem:[#allocation2 + $0x18] sm:$0xff] }
  0x62   :  { %378 = vmatprep.mubr.f32.mxu0 %v160_v2  ;;  %767 = vperm.xlu1 %1477, %v673_v4   ;;  %v71_v2 = vld [vmem:[%s2165_s0 + $0x50] sm:$0xff]  ;;  %v184_v8 = vcvt.s32.f32 %v120_v6 }
  0x63   :  { %v179_v3 = vcvt.s32.f32 %v115_v62  ;;  %v117_v4 = vunpack.c.0.s8 %v71_v2  ;;  %v123_v16 = vunpack.c.3.s8 %v71_v2 }
  0x64   :  { %772 = vperm.xlu0 %1476, %v674_v7  }
  0x65   :  { %379 = vmatmul.mubr.f32.gmra.mxu0 %v159_v5  ;;  %v182_v5 = vcvt.s32.f32 %v118_v0  ;;  %v181_v7 = vcvt.s32.f32 %v117_v4 }
  0x66   :  { %383 = vmatprep.mubr.f32.mxu0 %v162_v1  ;;  %777 = vperm.xlu1 %1477, %v675_v10   ;;  %v119_v1 = vunpack.c.1.s8 %v71_v2 }
  0x68   :  { %782 = vperm.xlu0 %1476, %v676_v13   ;;  %v183_v10 = vcvt.s32.f32 %v119_v1  ;;  %v186_v13 = vcvt.s32.f32 %v122_v9 }
  0x69   :  { %384 = vmatmul.mubr.f32.gmra.mxu0 %v161_v11  ;;  %v121_v11 = vunpack.c.2.s8 %v71_v2 }
  0x6a   :  { %388 = vmatprep.mubr.f32.mxu0 %v164_v14  ;;  %787 = vperm.xlu1 %1477, %v677_v17   ;;  %v124_v14 = vunpack.c.3.s8 %v72_v60 }
  0x6b   :  { %v185_v15 = vcvt.s32.f32 %v121_v11 }
  0x6c   :  { %792 = vperm.xlu0 %1476, %v678_v20   ;;  %v188_v17 = vcvt.s32.f32 %v124_v14 }
  0x6d   :  { %389 = vmatmul.mubr.f32.gmra.mxu0 %v163_v18  ;;  %v187_v18 = vcvt.s32.f32 %v123_v16  ;;  %v243_v16 = vld [vmem:[#allocation2 + $0x30] sm:$0xff] }
  0x6e   :  { %393 = vmatprep.mubr.f32.mxu0 %v166_v21  ;;  %797 = vperm.xlu1 %1477, %v679_v23   ;;  %v261_v21 = vld [vmem:[#allocation2 + $0xc0] sm:$0xff] }
  0x70   :  { %802 = vperm.xlu0 %1476, %v680_v26  }
  0x71   :  { %394 = vmatmul.mubr.f32.gmra.mxu0 %v165_v24  ;;  %v238_v24 = vld [vmem:[#allocation2 + $0x8] sm:$0xff] }
  0x72   :  { %398 = vmatprep.mubr.f32.mxu0 %v168_v27  ;;  %807 = vperm.xlu1 %1477, %v681_v29   ;;  %v262_v29 = vld [vmem:[#allocation2 + $0xc8] sm:$0xff] }
  0x74   :  { %812 = vperm.xlu0 %1476, %v682_v32   ;;  %v239_v32 = vld [vmem:[#allocation2 + $0x10] sm:$0xff] }
  0x75   :  { %399 = vmatmul.mubr.f32.gmra.mxu0 %v167_v30 }
  0x76   :  { %403 = vmatprep.mubr.f32.mxu0 %v170_v33  ;;  %817 = vperm.xlu1 %1477, %v683_v36   ;;  %v594_v36 = vld [vmem:[%s2167_s2] sm:$0xff] }
  0x78   :  { %822 = vperm.xlu0 %1476, %v684_v39  }
  0x79   :  { %404 = vmatmul.mubr.f32.gmra.mxu0 %v169_v37 }
  0x7a   :  { %408 = vmatprep.mubr.f32.mxu0 %v172_v40  ;;  %827 = vperm.xlu1 %1477, %v685_v43  }
  0x7c   :  { %832 = vperm.xlu0 %1476, %v686_v46  }
  0x7d   :  { %409 = vmatmul.mubr.f32.gmra.mxu0 %v171_v44 }
  0x7e   :  { %413 = vmatprep.mubr.f32.mxu0 %v174_v47  ;;  %837 = vperm.xlu1 %1477, %v687_v49  }
  0x80   :  { %842 = vperm.xlu0 %1476, %v688_v52  }
  0x81   :  { %414 = vmatmul.mubr.f32.gmra.mxu0 %v173_v50  ;;  %v264_v50 = vld [vmem:[#allocation2 + $0xd8] sm:$0xff] }
  0x82   :  { %418 = vmatprep.mubr.f32.mxu0 %v176_v53  ;;  %847 = vperm.xlu1 %1477, %v689_v55  }
  0x85   :  { %419 = vmatmul.mubr.f32.gmra.mxu0 %v175_v56 }
  0x86   :  { %423 = vmatprep.mubr.f32.mxu0 %v178_v58 }
  0x89   :  { %424 = vmatmul.mubr.f32.gmra.mxu0 %v177_v61  ;;  %v596_v61 = vld [vmem:[%s2167_s2 + $0x10] sm:$0xff] }
  0x8a   :  { %428 = vmatprep.mubr.f32.mxu0 %v180_v63  ;;  %v265_v63 = vld [vmem:[#allocation2 + $0xe0] sm:$0xff] }
  0x8d   :  { %429 = vmatmul.mubr.f32.gmra.mxu0 %v179_v3 }
  0x8e   :  { %433 = vmatprep.mubr.f32.mxu0 %v182_v5  ;;  %v242_v5 = vld [vmem:[#allocation2 + $0x28] sm:$0xff] }
  0x91   :  { %434 = vmatmul.mubr.f32.gmra.mxu0 %v181_v7 }
  0x92   :  { %438 = vmatprep.mubr.f32.mxu0 %v184_v8 }
  0x95   :  { %439 = vmatmul.mubr.f32.gmra.mxu0 %v183_v10  ;;  %v597_v10 = vld [vmem:[%s2167_s2 + $0x18] sm:$0xff] }
  0x96   :  { %443 = vmatprep.mubr.f32.mxu0 %v186_v13 }
  0x99   :  { %444 = vmatmul.mubr.f32.gmra.mxu0 %v185_v15 }
  0x9a   :  { %448 = vmatprep.mubr.f32.mxu0 %v188_v17 }
  0x9d   :  { %449 = vmatmul.mubr.f32.gmra.mxu0 %v187_v18 }
  0xbf   :  { %v693_v39 = vpop.permute.xlu0 %692 }
  0xc1   :  { %v703_v0 = vpop.permute.xlu1 %702 }
  0xc3   :  { %v698_v57 = vpop.permute.xlu0 %697 }
 0x101   :  { %v335_v20 = vpop.f32.mrf.mxu0 }
 0x102   :  { %v494_v22 = vadd.f32 %v335_v20, %v237_v19  ;;  %v708_v19 = vpop.permute.xlu1 %707 }
 0x103   :  { %v337_v23 = vpop.f32.mrf.mxu0  ;;  %v455_v25 = vpop.f32.mrf.mxu1 }
 0x104   :  { %527 = vst.msk [vmem:[#allocation2] sm:$0xff] %vm28_vm0, %v494_v22  ;;  %v518_v26 = vadd.f32 %v455_v25, %v261_v21  ;;  %v598_v23 = vld [vmem:[%s2167_s2 + $0x20] sm:$0xff]  ;;  %v267_v25 = vld [vmem:[#allocation2 + $0xf0] sm:$0xff] }
 0x105   :  { %v340_v27 = vpop.f32.mrf.mxu0  ;;  %v457_v28 = vpop.f32.mrf.mxu1 }
 0x106   :  { %v495_v30 = vadd.f32 %v340_v27, %v238_v24  ;;  %551 = vst.msk [vmem:[#allocation2 + $0xc0] sm:$0xff] %vm28_vm0, %v518_v26 }
 0x107   :  { %v342_v31 = vpop.f32.mrf.mxu0  ;;  %v460_v33 = vpop.f32.mrf.mxu1 }
 0x108   :  { %528 = vst.msk [vmem:[#allocation2 + $0x8] sm:$0xff] %vm28_vm0, %v495_v30  ;;  %v519_v34 = vadd.f32 %v460_v33, %v262_v29  ;;  %v244_v29 = vld [vmem:[#allocation2 + $0x38] sm:$0xff] }
 0x109   :  { %v345_v35 = vpop.f32.mrf.mxu0  ;;  %v462_v37 = vpop.f32.mrf.mxu1 }
 0x10a   :  { %v496_v40 = vadd.f32 %v345_v35, %v239_v32  ;;  %552 = vst.msk [vmem:[#allocation2 + $0xc8] sm:$0xff] %vm28_vm0, %v519_v34  ;;  %v713_v32 = vpop.permute.xlu0 %712 }
 0x10b   :  { %v347_v41 = vpop.f32.mrf.mxu0  ;;  %v562_v43 = vld [vmem:[#allocation2] sm:$0xff]  ;;  %v465_v44 = vpop.f32.mrf.mxu1 }
 0x10c   :  { %529 = vst.msk [vmem:[#allocation2 + $0x10] sm:$0xff] %vm28_vm0, %v496_v40  ;;  %v626_v45 = vadd.f32 %v594_v36, %v562_v43  ;;  %v520_v46 = vadd.f32 %v465_v44, %v263_v38  ;;  %v599_v36 = vld [vmem:[%s2167_s2 + $0x28] sm:$0xff]  ;;  %v268_v38 = vld [vmem:[#allocation2 + $0xf8] sm:$0xff] }
 0x10d   :  { %v350_v47 = vpop.f32.mrf.mxu0  ;;  %v467_v49 = vpop.f32.mrf.mxu1 }
 0x10e   :  { %v497_v51 = vadd.f32 %v350_v47, %v240_v42  ;;  %v850_v52 = vmul.f32 %v693_v39, %v626_v45  ;;  %553 = vst.msk [vmem:[#allocation2 + $0xd0] sm:$0xff] %vm28_vm0, %v520_v46  ;;  %v245_v42 = vld [vmem:[#allocation2 + $0x40] sm:$0xff]  ;;  %v718_v45 = vpop.permute.xlu1 %717  ;;  %v600_v49 = vld [vmem:[%s2167_s2 + $0x30] sm:$0xff] }
 0x10f   :  { %v352_v53 = vpop.f32.mrf.mxu0  ;;  %v563_v55 = vld [vmem:[#allocation2 + $0x8] sm:$0xff]  ;;  %v470_v56 = vpop.f32.mrf.mxu1 }
 0x110   :  { %530 = vst.msk [vmem:[#allocation2 + $0x18] sm:$0xff] %vm28_vm0, %v497_v51  ;;  %1359 = vmatprep.mubr.msk.f32.mxu1 %vm28_vm0, %v850_v52  ;;  %v627_v58 = vadd.f32 %v595_v48, %v563_v55  ;;  %v521_v59 = vadd.f32 %v470_v56, %v264_v50 }
 0x111   :  { %v355_v60 = vpop.f32.mrf.mxu0  ;;  %v472_v62 = vpop.f32.mrf.mxu1 }
 0x112   :  { %v498_v2 = vadd.f32 %v355_v60, %v241_v54  ;;  %v851_v3 = vmul.f32 %v698_v57, %v627_v58  ;;  %554 = vst.msk [vmem:[#allocation2 + $0xd8] sm:$0xff] %vm28_vm0, %v521_v59  ;;  %v246_v54 = vld [vmem:[#allocation2 + $0x48] sm:$0xff]  ;;  %v723_v57 = vpop.permute.xlu0 %722  ;;  %v601_v59 = vld [vmem:[%s2167_s2 + $0x38] sm:$0xff] }
 0x113   :  { %v357_v4 = vpop.f32.mrf.mxu0  ;;  %v564_v6 = vld [vmem:[#allocation2 + $0x10] sm:$0xff]  ;;  %v475_v7 = vpop.f32.mrf.mxu1 }
 0x114   :  { %531 = vst.msk [vmem:[#allocation2 + $0x20] sm:$0xff] %vm28_vm0, %v498_v2  ;;  %1360 = vmatmul.mubr.msk.f32.vlgmr.msra.gmra.mxu1 %vm28_vm0, %v851_v3  ;;  %v628_v1 = vadd.f32 %v596_v61, %v564_v6  ;;  %v522_v8 = vadd.f32 %v475_v7, %v265_v63  ;;  %v247_v63 = vld [vmem:[#allocation2 + $0x50] sm:$0xff]  ;;  %v728_v3 = vpop.permute.xlu1 %727 }
 0x115   :  { %v360_v9 = vpop.f32.mrf.mxu0  ;;  %v477_v11 = vpop.f32.mrf.mxu1 }
 0x116   :  { %v499_v13 = vadd.f32 %v360_v9, %v242_v5  ;;  %v852_v14 = vmul.f32 %v703_v0, %v628_v1  ;;  %555 = vst.msk [vmem:[#allocation2 + $0xe0] sm:$0xff] %vm28_vm0, %v522_v8  ;;  %v602_v5 = vld [vmem:[%s2167_s2 + $0x40] sm:$0xff]  ;;  %v248_v8 = vld [vmem:[#allocation2 + $0x58] sm:$0xff]  ;;  %v733_v11 = vpop.permute.xlu0 %732 }
 0x117   :  { %v362_v15 = vpop.f32.mrf.mxu0  ;;  %v565_v17 = vld [vmem:[#allocation2 + $0x18] sm:$0xff]  ;;  %v480_v18 = vpop.f32.mrf.mxu1 }
 0x118   :  { %532 = vst.msk [vmem:[#allocation2 + $0x28] sm:$0xff] %vm28_vm0, %v499_v13  ;;  %1362 = vmatprep.mubr.msk.f32.mxu1 %vm28_vm0, %v852_v14  ;;  %v629_v20 = vadd.f32 %v597_v10, %v565_v17  ;;  %v523_v21 = vadd.f32 %v480_v18, %v266_v12  ;;  %v603_v13 = vld [vmem:[%s2167_s2 + $0x48] sm:$0xff]  ;;  %v249_v17 = vld [vmem:[#allocation2 + $0x60] sm:$0xff] }
 0x119   :  { %v365_v22 = vpop.f32.mrf.mxu0  ;;  %v482_v24 = vpop.f32.mrf.mxu1 }
 0x11a   :  { %v500_v26 = vadd.f32 %v365_v22, %v243_v16  ;;  %v853_v27 = vmul.f32 %v708_v19, %v629_v20  ;;  %556 = vst.msk [vmem:[#allocation2 + $0xe8] sm:$0xff] %vm28_vm0, %v523_v21  ;;  %v738_v20 = vpop.permute.xlu1 %737  ;;  %v604_v22 = vld [vmem:[%s2167_s2 + $0x50] sm:$0xff] }
 0x11b   :  { %v367_v28 = vpop.f32.mrf.mxu0  ;;  %v566_v30 = vld [vmem:[#allocation2 + $0x20] sm:$0xff]  ;;  %v485_v31 = vpop.f32.mrf.mxu1 }
 0x11c   :  { %533 = vst.msk [vmem:[#allocation2 + $0x30] sm:$0xff] %vm28_vm0, %v500_v26  ;;  %1363 = vmatmul.mubr.msk.f32.gmra.mxu1 %vm28_vm0, %v853_v27  ;;  %v630_v33 = vadd.f32 %v598_v23, %v566_v30  ;;  %v524_v34 = vadd.f32 %v485_v31, %v267_v25  ;;  %v250_v26 = vld [vmem:[#allocation2 + $0x68] sm:$0xff]  ;;  %v605_v31 = vld [vmem:[%s2167_s2 + $0x58] sm:$0xff] }
 0x11d   :  { %v370_v35 = vpop.f32.mrf.mxu0  ;;  %v487_v37 = vpop.f32.mrf.mxu1 }
 0x11e   :  { %v501_v39 = vadd.f32 %v370_v35, %v244_v29  ;;  %v854_v40 = vmul.f32 %v713_v32, %v630_v33  ;;  %557 = vst.msk [vmem:[#allocation2 + $0xf0] sm:$0xff] %vm28_vm0, %v524_v34  ;;  %v743_v29 = vpop.permute.xlu0 %742  ;;  %v251_v35 = vld [vmem:[#allocation2 + $0x70] sm:$0xff] }
 0x11f   :  { %v372_v41 = vpop.f32.mrf.mxu0  ;;  %v567_v43 = vld [vmem:[#allocation2 + $0x28] sm:$0xff]  ;;  %v490_v44 = vpop.f32.mrf.mxu1 }
 0x120   :  { %534 = vst.msk [vmem:[#allocation2 + $0x38] sm:$0xff] %vm28_vm0, %v501_v39  ;;  %1365 = vmatprep.mubr.msk.f32.mxu1 %vm28_vm0, %v854_v40  ;;  %v631_v46 = vadd.f32 %v599_v36, %v567_v43  ;;  %v525_v47 = vadd.f32 %v490_v44, %v268_v38  ;;  %v748_v38 = vpop.permute.xlu1 %747  ;;  %v606_v40 = vld [vmem:[%s2167_s2 + $0x60] sm:$0xff]  ;;  %v252_v44 = vld [vmem:[#allocation2 + $0x78] sm:$0xff] }
 0x121   :  { %v375_v48 = vpop.f32.mrf.mxu0  ;;  %v492_v50 = vpop.f32.mrf.mxu1 }
 0x122   :  { %v502_v51 = vadd.f32 %v375_v48, %v245_v42  ;;  %v855_v52 = vmul.f32 %v718_v45, %v631_v46  ;;  %558 = vst.msk [vmem:[#allocation2 + $0xf8] sm:$0xff] %vm28_vm0, %v525_v47  ;;  %v753_v47 = vpop.permute.xlu0 %752 }
 0x123   :  { %v377_v53 = vpop.f32.mrf.mxu0  ;;  %v568_v55 = vld [vmem:[#allocation2 + $0x30] sm:$0xff] }
 0x124   :  { %535 = vst.msk [vmem:[#allocation2 + $0x40] sm:$0xff] %vm28_vm0, %v502_v51  ;;  %1366 = vmatmul.mubr.msk.f32.gmra.mxu1 %vm28_vm0, %v855_v52  ;;  %v632_v56 = vadd.f32 %v600_v49, %v568_v55  ;;  %v607_v49 = vld [vmem:[%s2167_s2 + $0x68] sm:$0xff]  ;;  %v253_v53 = vld [vmem:[#allocation2 + $0x80] sm:$0xff] }
 0x125   :  { %v380_v58 = vpop.f32.mrf.mxu0 }
 0x126   :  { %v503_v60 = vadd.f32 %v380_v58, %v246_v54  ;;  %v856_v61 = vmul.f32 %v723_v57, %v632_v56  ;;  %v758_v56 = vpop.permute.xlu1 %757  ;;  %v608_v58 = vld [vmem:[%s2167_s2 + $0x70] sm:$0xff] }
 0x127   :  { %v382_v62 = vpop.f32.mrf.mxu0  ;;  %v569_v0 = vld [vmem:[#allocation2 + $0x38] sm:$0xff] }
 0x128   :  { %536 = vst.msk [vmem:[#allocation2 + $0x48] sm:$0xff] %vm28_vm0, %v503_v60  ;;  %1368 = vmatprep.mubr.msk.f32.mxu1 %vm28_vm0, %v856_v61  ;;  %v633_v2 = vadd.f32 %v601_v59, %v569_v0  ;;  %v254_v62 = vld [vmem:[#allocation2 + $0x88] sm:$0xff]  ;;  %v763_v0 = vpop.permute.xlu0 %762 }
 0x129   :  { %v385_v4 = vpop.f32.mrf.mxu0 }
 0x12a   :  { %v504_v6 = vadd.f32 %v385_v4, %v247_v63  ;;  %v857_v7 = vmul.f32 %v728_v3, %v633_v2  ;;  %v609_v4 = vld [vmem:[%s2167_s2 + $0x78] sm:$0xff] }
 0x12b   :  { %v387_v1 = vpop.f32.mrf.mxu0  ;;  %v570_v9 = vld [vmem:[#allocation2 + $0x40] sm:$0xff] }
 0x12c   :  { %537 = vst.msk [vmem:[#allocation2 + $0x50] sm:$0xff] %vm28_vm0, %v504_v6  ;;  %1369 = vmatmul.mubr.msk.f32.gmra.mxu1 %vm28_vm0, %v857_v7  ;;  %v634_v10 = vadd.f32 %v602_v5, %v570_v9  ;;  %v768_v7 = vpop.permute.xlu1 %767 }
 0x12d   :  { %v390_v12 = vpop.f32.mrf.mxu0 }
 0x12e   :  { %v505_v14 = vadd.f32 %v390_v12, %v248_v8  ;;  %v858_v15 = vmul.f32 %v733_v11, %v634_v10  ;;  %v255_v8 = vld [vmem:[#allocation2 + $0x90] sm:$0xff]  ;;  %v610_v12 = vld [vmem:[%s2167_s2 + $0x80] sm:$0xff] }
 0x12f   :  { %v392_v16 = vpop.f32.mrf.mxu0  ;;  %v571_v18 = vld [vmem:[#allocation2 + $0x48] sm:$0xff] }
 0x130   :  { %538 = vst.msk [vmem:[#allocation2 + $0x58] sm:$0xff] %vm28_vm0, %v505_v14  ;;  %1371 = vmatprep.mubr.msk.f32.mxu1 %vm28_vm0, %v858_v15  ;;  %v635_v19 = vadd.f32 %v603_v13, %v571_v18  ;;  %v773_v13 = vpop.permute.xlu0 %772 }
 0x131   :  { %v395_v21 = vpop.f32.mrf.mxu0 }
 0x132   :  { %v506_v23 = vadd.f32 %v395_v21, %v249_v17  ;;  %v859_v24 = vmul.f32 %v738_v20, %v635_v19  ;;  %v256_v17 = vld [vmem:[#allocation2 + $0x98] sm:$0xff]  ;;  %v778_v20 = vpop.permute.xlu1 %777 }
 0x133   :  { %v397_v25 = vpop.f32.mrf.mxu0  ;;  %v572_v27 = vld [vmem:[#allocation2 + $0x50] sm:$0xff] }
 0x134   :  { %539 = vst.msk [vmem:[#allocation2 + $0x60] sm:$0xff] %vm28_vm0, %v506_v23  ;;  %1372 = vmatmul.mubr.msk.f32.gmra.mxu1 %vm28_vm0, %v859_v24  ;;  %v636_v28 = vadd.f32 %v604_v22, %v572_v27  ;;  %v611_v22 = vld [vmem:[%s2167_s2 + $0x88] sm:$0xff] }
 0x135   :  { %v400_v30 = vpop.f32.mrf.mxu0 }
 0x136   :  { %v507_v32 = vadd.f32 %v400_v30, %v250_v26  ;;  %v860_v33 = vmul.f32 %v743_v29, %v636_v28  ;;  %v257_v26 = vld [vmem:[#allocation2 + $0xa0] sm:$0xff]  ;;  %v783_v28 = vpop.permute.xlu0 %782 }
 0x137   :  { %v402_v34 = vpop.f32.mrf.mxu0  ;;  %v573_v36 = vld [vmem:[#allocation2 + $0x58] sm:$0xff] }
 0x138   :  { %540 = vst.msk [vmem:[#allocation2 + $0x68] sm:$0xff] %vm28_vm0, %v507_v32  ;;  %1374 = vmatprep.mubr.msk.f32.mxu1 %vm28_vm0, %v860_v33  ;;  %v637_v37 = vadd.f32 %v605_v31, %v573_v36  ;;  %v612_v31 = vld [vmem:[%s2167_s2 + $0x90] sm:$0xff]  ;;  %v788_v34 = vpop.permute.xlu1 %787  ;;  %v258_v36 = vld [vmem:[#allocation2 + $0xa8] sm:$0xff] }
 0x139   :  { %v405_v39 = vpop.f32.mrf.mxu0 }
 0x13a   :  { %v508_v41 = vadd.f32 %v405_v39, %v251_v35  ;;  %v861_v42 = vmul.f32 %v748_v38, %v637_v37 }
 0x13b   :  { %v407_v43 = vpop.f32.mrf.mxu0  ;;  %v574_v45 = vld [vmem:[#allocation2 + $0x60] sm:$0xff] }
 0x13c   :  { %541 = vst.msk [vmem:[#allocation2 + $0x70] sm:$0xff] %vm28_vm0, %v508_v41  ;;  %1375 = vmatmul.mubr.msk.f32.gmra.mxu1 %vm28_vm0, %v861_v42  ;;  %v638_v46 = vadd.f32 %v606_v40, %v574_v45  ;;  %v613_v40 = vld [vmem:[%s2167_s2 + $0x98] sm:$0xff]  ;;  %v793_v41 = vpop.permute.xlu0 %792  ;;  %v259_v45 = vld [vmem:[#allocation2 + $0xb0] sm:$0xff] }
 0x13d   :  { %v410_v48 = vpop.f32.mrf.mxu0 }
 0x13e   :  { %v509_v50 = vadd.f32 %v410_v48, %v252_v44  ;;  %v862_v51 = vmul.f32 %v753_v47, %v638_v46  ;;  %v798_v48 = vpop.permute.xlu1 %797 }
 0x13f   :  { %v412_v52 = vpop.f32.mrf.mxu0  ;;  %v575_v54 = vld [vmem:[#allocation2 + $0x68] sm:$0xff] }
 0x140   :  { %542 = vst.msk [vmem:[#allocation2 + $0x78] sm:$0xff] %vm28_vm0, %v509_v50  ;;  %1377 = vmatprep.mubr.msk.f32.mxu1 %vm28_vm0, %v862_v51  ;;  %v639_v55 = vadd.f32 %v607_v49, %v575_v54  ;;  %v614_v50 = vld [vmem:[%s2167_s2 + $0xa0] sm:$0xff]  ;;  %v260_v54 = vld [vmem:[#allocation2 + $0xb8] sm:$0xff] }
 0x141   :  { %v415_v57 = vpop.f32.mrf.mxu0 }
 0x142   :  { %v510_v59 = vadd.f32 %v415_v57, %v253_v53  ;;  %v863_v60 = vmul.f32 %v758_v56, %v639_v55  ;;  %v803_v56 = vpop.permute.xlu0 %802 }
 0x143   :  { %v417_v61 = vpop.f32.mrf.mxu0  ;;  %v576_v63 = vld [vmem:[#allocation2 + $0x70] sm:$0xff] }
 0x144   :  { %543 = vst.msk [vmem:[#allocation2 + $0x80] sm:$0xff] %vm28_vm0, %v510_v59  ;;  %1378 = vmatmul.mubr.msk.f32.gmra.mxu1 %vm28_vm0, %v863_v60  ;;  %v640_v2 = vadd.f32 %v608_v58, %v576_v63  ;;  %v615_v59 = vld [vmem:[%s2167_s2 + $0xa8] sm:$0xff] }
 0x145   :  { %v420_v3 = vpop.f32.mrf.mxu0 }
 0x146   :  { %v511_v5 = vadd.f32 %v420_v3, %v254_v62  ;;  %v864_v6 = vmul.f32 %v763_v0, %v640_v2  ;;  %v808_v62 = vpop.permute.xlu1 %807  ;;  %v616_v3 = vld [vmem:[%s2167_s2 + $0xb0] sm:$0xff] }
 0x147   :  { %v422_v1 = vpop.f32.mrf.mxu0  ;;  %v577_v9 = vld [vmem:[#allocation2 + $0x78] sm:$0xff] }
 0x148   :  { %544 = vst.msk [vmem:[#allocation2 + $0x88] sm:$0xff] %vm28_vm0, %v511_v5  ;;  %1380 = vmatprep.mubr.msk.f32.mxu1 %vm28_vm0, %v864_v6  ;;  %v641_v10 = vadd.f32 %v609_v4, %v577_v9  ;;  %v813_v4 = vpop.permute.xlu0 %812  ;;  %v618_v1 = vld [vmem:[%s2167_s2 + $0xc0] sm:$0xff] }
 0x149   :  { %v425_v11 = vpop.f32.mrf.mxu0 }
 0x14a   :  { %v512_v14 = vadd.f32 %v425_v11, %v255_v8  ;;  %v865_v15 = vmul.f32 %v768_v7, %v641_v10  ;;  %v586_v7 = vld [vmem:[#allocation2 + $0xc0] sm:$0xff]  ;;  %v818_v9 = vpop.permute.xlu1 %817  ;;  %v617_v10 = vld [vmem:[%s2167_s2 + $0xb8] sm:$0xff] }
 0x14b   :  { %v427_v16 = vpop.f32.mrf.mxu0  ;;  %v578_v18 = vld [vmem:[#allocation2 + $0x80] sm:$0xff] }
 0x14c   :  { %545 = vst.msk [vmem:[#allocation2 + $0x90] sm:$0xff] %vm28_vm0, %v512_v14  ;;  %1381 = vmatmul.mubr.msk.f32.gmra.mxu1 %vm28_vm0, %v865_v15  ;;  %v642_v19 = vadd.f32 %v610_v12, %v578_v18  ;;  %v650_v12 = vadd.f32 %v618_v1, %v586_v7  ;;  %v619_v14 = vld [vmem:[%s2167_s2 + $0xc8] sm:$0xff]  ;;  %v823_v16 = vpop.permute.xlu0 %822  ;;  %v620_v18 = vld [vmem:[%s2167_s2 + $0xd0] sm:$0xff] }
 0x14d   :  { %v430_v21 = vpop.f32.mrf.mxu0 }
 0x14e   :  { %v513_v23 = vadd.f32 %v430_v21, %v256_v17  ;;  %v866_v24 = vmul.f32 %v773_v13, %v642_v19  ;;  %v587_v13 = vld [vmem:[#allocation2 + $0xc8] sm:$0xff]  ;;  %v588_v17 = vld [vmem:[#allocation2 + $0xd0] sm:$0xff] }
 0x14f   :  { %v432_v25 = vpop.f32.mrf.mxu0  ;;  %v579_v27 = vld [vmem:[#allocation2 + $0x88] sm:$0xff] }
 0x150   :  { %546 = vst.msk [vmem:[#allocation2 + $0x98] sm:$0xff] %vm28_vm0, %v513_v23  ;;  %1383 = vmatprep.mubr.msk.f32.mxu1 %vm28_vm0, %v866_v24  ;;  %v643_v29 = vadd.f32 %v611_v22, %v579_v27  ;;  %v874_v22 = vmul.f32 %v813_v4, %v650_v12  ;;  %v652_v23 = vadd.f32 %v620_v18, %v588_v17  ;;  %v828_v24 = vpop.permute.xlu1 %827  ;;  %v589_v25 = vld [vmem:[#allocation2 + $0xd8] sm:$0xff]  ;;  %v590_v27 = vld [vmem:[#allocation2 + $0xe0] sm:$0xff] }
 0x151   :  { %v435_v30 = vpop.f32.mrf.mxu0 }
 0x152   :  { %v514_v32 = vadd.f32 %v435_v30, %v257_v26  ;;  %v867_v33 = vmul.f32 %v778_v20, %v643_v29  ;;  %v651_v20 = vadd.f32 %v619_v14, %v587_v13  ;;  %v621_v26 = vld [vmem:[%s2167_s2 + $0xd8] sm:$0xff] }
 0x153   :  { %v437_v35 = vpop.f32.mrf.mxu0  ;;  %v580_v37 = vld [vmem:[#allocation2 + $0x90] sm:$0xff]  ;;  %v653_v30 = vadd.f32 %v621_v26, %v589_v25 }
 0x154   :  { %547 = vst.msk [vmem:[#allocation2 + $0xa0] sm:$0xff] %vm28_vm0, %v514_v32  ;;  %1384 = vmatmul.mubr.msk.f32.gmra.mxu1 %vm28_vm0, %v867_v33  ;;  %v644_v38 = vadd.f32 %v612_v31, %v580_v37  ;;  %v875_v29 = vmul.f32 %v818_v9, %v651_v20  ;;  %v833_v31 = vpop.permute.xlu0 %832  ;;  %v876_v32 = vmul.f32 %v823_v16, %v652_v23  ;;  %v623_v35 = vld [vmem:[%s2167_s2 + $0xe8] sm:$0xff]  ;;  %v624_v37 = vld [vmem:[%s2167_s2 + $0xf0] sm:$0xff] }
 0x155   :  { %v440_v39 = vpop.f32.mrf.mxu0 }
 0x156   :  { %v515_v42 = vadd.f32 %v440_v39, %v258_v36  ;;  %v868_v43 = vmul.f32 %v783_v28, %v644_v38  ;;  %v622_v28 = vld [vmem:[%s2167_s2 + $0xe0] sm:$0xff]  ;;  %v592_v36 = vld [vmem:[#allocation2 + $0xf0] sm:$0xff]  ;;  %v838_v38 = vpop.permute.xlu1 %837  ;;  %v877_v39 = vmul.f32 %v828_v24, %v653_v30 }
 0x157   :  { %v442_v44 = vpop.f32.mrf.mxu0  ;;  %v581_v46 = vld [vmem:[#allocation2 + $0x98] sm:$0xff]  ;;  %v654_v33 = vadd.f32 %v622_v28, %v590_v27 }
 0x158   :  { %548 = vst.msk [vmem:[#allocation2 + $0xa8] sm:$0xff] %vm28_vm0, %v515_v42  ;;  %1386 = vmatprep.mubr.msk.f32.mxu1 %vm28_vm0, %v868_v43  ;;  %v645_v47 = vadd.f32 %v613_v40, %v581_v46  ;;  %v656_v42 = vadd.f32 %v624_v37, %v592_v36  ;;  %v593_v43 = vld [vmem:[#allocation2 + $0xf8] sm:$0xff] }
 0x159   :  { %v445_v49 = vpop.f32.mrf.mxu0  ;;  %v625_v44 = vld [vmem:[%s2167_s2 + $0xf8] sm:$0xff]  ;;  %s1502_s2 = smov [#allocation3]  }
 0x15a   :  { %v516_v51 = vadd.f32 %v445_v49, %v259_v45  ;;  %v869_v52 = vmul.f32 %v788_v34, %v645_v47  ;;  %v591_v34 = vld [vmem:[#allocation2 + $0xe8] sm:$0xff]  ;;  %v843_v45 = vpop.permute.xlu0 %842  ;;  %v657_v47 = vadd.f32 %v625_v44, %v593_v43  ;;  %v848_v49 = vpop.permute.xlu1 %847 }
 0x15b   :  { %v447_v53 = vpop.f32.mrf.mxu0  ;;  %v582_v55 = vld [vmem:[#allocation2 + $0xa0] sm:$0xff]  ;;  %v655_v40 = vadd.f32 %v623_v35, %v591_v34 }
 0x15c   :  { %549 = vst.msk [vmem:[#allocation2 + $0xb0] sm:$0xff] %vm28_vm0, %v516_v51  ;;  %1387 = vmatmul.mubr.msk.f32.gmra.mxu1 %vm28_vm0, %v869_v52  ;;  %v646_v57 = vadd.f32 %v614_v50, %v582_v55  ;;  %v881_v50 = vmul.f32 %v848_v49, %v657_v47  ;;  %v2128_v51 = vld [vmem:[%s2170_s5] ss:$0 sm:$0xff]  ;;  %s1280_s5 = sshll.u32 %s1502_s2, 4  ;;  %s1281_s5 = int_to_ptr.vmem [resolvable:$true] %s1280_s5 }
 0x15d   :  { %v450_v58 = vpop.f32.mrf.mxu0  ;;  %v879_v46 = vmul.f32 %v838_v38, %v655_v40  ;;  %s1478_s18 = scalar_lea.vmem %s1281_s5, 4096  ;;  %p1483_p1 = scmp.lt.s32.totalorder %s1281_s5, %s1281_s5 }
 0x15e   :  { %v517_v60 = vadd.f32 %v450_v58, %v260_v54  ;;  %v870_v61 = vmul.f32 %v793_v41, %v646_v57  ;;  %v878_v41 = vmul.f32 %v833_v31, %v654_v33  ;;  %p1479_p0 = scmp.ne.s32.totalorder %s1281_s5, %s1478_s18  ;;  %p1484_p2 = scmp.lt.s32.totalorder %s1478_s18, %s1478_s18 }
 0x15f   :  { %v452_v63 = vpop.f32.mrf.mxu0  ;;  %v583_v0 = vld [vmem:[#allocation2 + $0xa8] sm:$0xff] }
 0x160   :  { %550 = vst.msk [vmem:[#allocation2 + $0xb8] sm:$0xff] %vm28_vm0, %v517_v60  ;;  %1389 = vmatprep.mubr.msk.f32.mxu1 %vm28_vm0, %v870_v61  ;;  %v647_v2 = vadd.f32 %v615_v59, %v583_v0  ;;  %p1485_p3 = por %p1484_p2, %p1483_p1 }
 0x162   :  { %v871_v5 = vmul.f32 %v798_v48, %v647_v2  ;;  %v880_v48 = vmul.f32 %v843_v45, %v656_v42  ;;  %p1486_p4 = pnand %p1485_p3, %p1479_p0 }
 0x163   :  { %v584_v6 = vld [vmem:[#allocation2 + $0xb0] sm:$0xff] }
 0x164   :  { %1390 = vmatmul.mubr.msk.f32.gmra.mxu1 %vm28_vm0, %v871_v5  ;;  %v648_v8 = vadd.f32 %v616_v3, %v584_v6 }
 0x166   :  { %v872_v11 = vmul.f32 %v803_v56, %v648_v8 }
 0x167   :  { %v585_v15 = vld [vmem:[#allocation2 + $0xb8] sm:$0xff] }
 0x168   :  { %1392 = vmatprep.mubr.msk.f32.mxu1 %vm28_vm0, %v872_v11  ;;  %v649_v19 = vadd.f32 %v617_v10, %v585_v15 }
 0x16a   :  { %v873_v21 = vmul.f32 %v808_v62, %v649_v19 }
 0x16c   :  { %1393 = vmatmul.mubr.msk.f32.gmra.mxu1 %vm28_vm0, %v873_v21 }
 0x16d   :  { %1395 = vmatprep.mubr.msk.f32.mxu1 %vm28_vm0, %v874_v22 }
 0x170   :  { %1396 = vmatmul.mubr.msk.f32.gmra.mxu1 %vm28_vm0, %v875_v29 }
 0x171   :  { %1398 = vmatprep.mubr.msk.f32.mxu1 %vm28_vm0, %v876_v32 }
 0x174   :  { %1399 = vmatmul.mubr.msk.f32.gmra.mxu1 %vm28_vm0, %v877_v39 }
 0x175   :  { %1401 = vmatprep.mubr.msk.f32.mxu1 %vm28_vm0, %v878_v41 }
 0x178   :  { %1402 = vmatmul.mubr.msk.f32.gmra.mxu1 %vm28_vm0, %v879_v46 }
 0x179   :  { %1404 = vmatprep.mubr.msk.f32.mxu1 %vm28_vm0, %v880_v48 }
 0x17c   :  { %1405 = vmatmul.mubr.msk.f32.gmra.mxu1 %vm28_vm0, %v881_v50 }
 0x1d4   :  { %v1361_v52 = vpop.f32.mrf.mxu1 }
 0x1d5   :  { %v1058_v53 = vadd.f32 %v1361_v52, %v2128_v51 }
 0x1d6   :  { %v1052_v54 = vpop.f32.mrf.mxu1 }
 0x1d7   :  { %v1212_v55 = vmax.f32 %v1058_v53, 0.0  ;;  %v1053_v56 = vadd.f32 %v2128_v51, %v1052_v54 }
 0x1d9   :  { %1244 = vst [vmem:[#allocation3 + $0x8] sm:$0xff] %v1212_v55  ;;  %v1211_v57 = vmax.f32 %v1053_v56, 0.0 }
 0x1db   :  { %1243 = vst [vmem:[#allocation3] sm:$0xff] %v1211_v57 }
 0x1dc   :  { %v1364_v58 = vpop.f32.mrf.mxu1 }
 0x1dd   :  { %v1068_v59 = vadd.f32 %v1364_v58, %v2128_v51 }
 0x1de   :  { %v1062_v60 = vpop.f32.mrf.mxu1 }
 0x1df   :  { %v1214_v61 = vmax.f32 %v1068_v59, 0.0  ;;  %v1063_v62 = vadd.f32 %v2128_v51, %v1062_v60 }
 0x1e1   :  { %1246 = vst [vmem:[#allocation3 + $0x18] sm:$0xff] %v1214_v61  ;;  %v1213_v63 = vmax.f32 %v1063_v62, 0.0 }
 0x1e3   :  { %1245 = vst [vmem:[#allocation3 + $0x10] sm:$0xff] %v1213_v63 }
 0x1e4   :  { %v1367_v0 = vpop.f32.mrf.mxu1 }
 0x1e5   :  { %v1078_v2 = vadd.f32 %v1367_v0, %v2128_v51 }
 0x1e6   :  { %v1072_v3 = vpop.f32.mrf.mxu1 }
 0x1e7   :  { %v1216_v4 = vmax.f32 %v1078_v2, 0.0  ;;  %v1073_v5 = vadd.f32 %v2128_v51, %v1072_v3 }
 0x1e9   :  { %1248 = vst [vmem:[#allocation3 + $0x28] sm:$0xff] %v1216_v4  ;;  %v1215_v6 = vmax.f32 %v1073_v5, 0.0 }
 0x1eb   :  { %1247 = vst [vmem:[#allocation3 + $0x20] sm:$0xff] %v1215_v6 }
 0x1ec   :  { %v1370_v7 = vpop.f32.mrf.mxu1 }
 0x1ed   :  { %v1088_v1 = vadd.f32 %v1370_v7, %v2128_v51 }
 0x1ee   :  { %v1082_v8 = vpop.f32.mrf.mxu1 }
 0x1ef   :  { %v1218_v9 = vmax.f32 %v1088_v1, 0.0  ;;  %v1083_v10 = vadd.f32 %v2128_v51, %v1082_v8 }
 0x1f1   :  { %1250 = vst [vmem:[#allocation3 + $0x38] sm:$0xff] %v1218_v9  ;;  %v1217_v11 = vmax.f32 %v1083_v10, 0.0 }
 0x1f3   :  { %1249 = vst [vmem:[#allocation3 + $0x30] sm:$0xff] %v1217_v11 }
 0x1f4   :  { %v1373_v12 = vpop.f32.mrf.mxu1 }
 0x1f5   :  { %v1098_v13 = vadd.f32 %v1373_v12, %v2128_v51 }
 0x1f6   :  { %v1092_v14 = vpop.f32.mrf.mxu1 }
 0x1f7   :  { %v1220_v15 = vmax.f32 %v1098_v13, 0.0  ;;  %v1093_v16 = vadd.f32 %v2128_v51, %v1092_v14 }
 0x1f9   :  { %1252 = vst [vmem:[#allocation3 + $0x48] sm:$0xff] %v1220_v15  ;;  %v1219_v17 = vmax.f32 %v1093_v16, 0.0 }
 0x1fb   :  { %1251 = vst [vmem:[#allocation3 + $0x40] sm:$0xff] %v1219_v17 }
 0x1fc   :  { %v1376_v18 = vpop.f32.mrf.mxu1 }
 0x1fd   :  { %v1108_v19 = vadd.f32 %v1376_v18, %v2128_v51 }
 0x1fe   :  { %v1102_v20 = vpop.f32.mrf.mxu1 }
 0x1ff   :  { %v1222_v21 = vmax.f32 %v1108_v19, 0.0  ;;  %v1103_v22 = vadd.f32 %v2128_v51, %v1102_v20 }
 0x201   :  { %1254 = vst [vmem:[#allocation3 + $0x58] sm:$0xff] %v1222_v21  ;;  %v1221_v23 = vmax.f32 %v1103_v22, 0.0 }
 0x203   :  { %1253 = vst [vmem:[#allocation3 + $0x50] sm:$0xff] %v1221_v23 }
 0x204   :  { %v1379_v24 = vpop.f32.mrf.mxu1 }
 0x205   :  { %v1118_v25 = vadd.f32 %v1379_v24, %v2128_v51 }
 0x206   :  { %v1112_v26 = vpop.f32.mrf.mxu1 }
 0x207   :  { %v1224_v27 = vmax.f32 %v1118_v25, 0.0  ;;  %v1113_v28 = vadd.f32 %v2128_v51, %v1112_v26 }
 0x209   :  { %1256 = vst [vmem:[#allocation3 + $0x68] sm:$0xff] %v1224_v27  ;;  %v1223_v29 = vmax.f32 %v1113_v28, 0.0 }
 0x20b   :  { %1255 = vst [vmem:[#allocation3 + $0x60] sm:$0xff] %v1223_v29 }
 0x20c   :  { %v1382_v30 = vpop.f32.mrf.mxu1 }
 0x20d   :  { %v1128_v31 = vadd.f32 %v1382_v30, %v2128_v51 }
 0x20e   :  { %v1122_v32 = vpop.f32.mrf.mxu1 }
 0x20f   :  { %v1226_v33 = vmax.f32 %v1128_v31, 0.0  ;;  %v1123_v34 = vadd.f32 %v2128_v51, %v1122_v32 }
 0x211   :  { %1258 = vst [vmem:[#allocation3 + $0x78] sm:$0xff] %v1226_v33  ;;  %v1225_v35 = vmax.f32 %v1123_v34, 0.0 }
 0x213   :  { %1257 = vst [vmem:[#allocation3 + $0x70] sm:$0xff] %v1225_v35 }
 0x214   :  { %v1385_v36 = vpop.f32.mrf.mxu1 }
 0x215   :  { %v1138_v37 = vadd.f32 %v1385_v36, %v2128_v51 }
 0x216   :  { %v1132_v38 = vpop.f32.mrf.mxu1 }
 0x217   :  { %v1228_v39 = vmax.f32 %v1138_v37, 0.0  ;;  %v1133_v40 = vadd.f32 %v2128_v51, %v1132_v38 }
 0x219   :  { %1260 = vst [vmem:[#allocation3 + $0x88] sm:$0xff] %v1228_v39  ;;  %v1227_v41 = vmax.f32 %v1133_v40, 0.0 }
 0x21b   :  { %1259 = vst [vmem:[#allocation3 + $0x80] sm:$0xff] %v1227_v41 }
 0x21c   :  { %v1388_v42 = vpop.f32.mrf.mxu1 }
 0x21d   :  { %v1148_v43 = vadd.f32 %v1388_v42, %v2128_v51 }
 0x21e   :  { %v1142_v44 = vpop.f32.mrf.mxu1 }
 0x21f   :  { %v1230_v45 = vmax.f32 %v1148_v43, 0.0  ;;  %v1143_v46 = vadd.f32 %v2128_v51, %v1142_v44 }
 0x221   :  { %1262 = vst [vmem:[#allocation3 + $0x98] sm:$0xff] %v1230_v45  ;;  %v1229_v47 = vmax.f32 %v1143_v46, 0.0 }
 0x223   :  { %1261 = vst [vmem:[#allocation3 + $0x90] sm:$0xff] %v1229_v47 }
 0x224   :  { %v1391_v48 = vpop.f32.mrf.mxu1 }
 0x225   :  { %v1158_v49 = vadd.f32 %v1391_v48, %v2128_v51 }
 0x226   :  { %v1152_v50 = vpop.f32.mrf.mxu1 }
 0x227   :  { %v1232_v52 = vmax.f32 %v1158_v49, 0.0  ;;  %v1153_v53 = vadd.f32 %v2128_v51, %v1152_v50 }
 0x229   :  { %1264 = vst [vmem:[#allocation3 + $0xa8] sm:$0xff] %v1232_v52  ;;  %v1231_v54 = vmax.f32 %v1153_v53, 0.0 }
 0x22b   :  { %1263 = vst [vmem:[#allocation3 + $0xa0] sm:$0xff] %v1231_v54 }
 0x22c   :  { %v1394_v55 = vpop.f32.mrf.mxu1 }
 0x22d   :  { %v1168_v56 = vadd.f32 %v1394_v55, %v2128_v51 }
 0x22e   :  { %v1162_v57 = vpop.f32.mrf.mxu1 }
 0x22f   :  { %v1234_v58 = vmax.f32 %v1168_v56, 0.0  ;;  %v1163_v59 = vadd.f32 %v2128_v51, %v1162_v57 }
 0x230   :  { %v1397_v60 = vpop.f32.mrf.mxu1 }
 0x231   :  { %1266 = vst [vmem:[#allocation3 + $0xb8] sm:$0xff] %v1234_v58  ;;  %v1233_v61 = vmax.f32 %v1163_v59, 0.0  ;;  %v1178_v62 = vadd.f32 %v1397_v60, %v2128_v51 }
 0x232   :  { %v1172_v63 = vpop.f32.mrf.mxu1 }
 0x233   :  { %1265 = vst [vmem:[#allocation3 + $0xb0] sm:$0xff] %v1233_v61  ;;  %v1236_v0 = vmax.f32 %v1178_v62, 0.0  ;;  %v1173_v2 = vadd.f32 %v2128_v51, %v1172_v63 }
 0x234   :  { %v1400_v3 = vpop.f32.mrf.mxu1 }
 0x235   :  { %1268 = vst [vmem:[#allocation3 + $0xc8] sm:$0xff] %v1236_v0  ;;  %v1235_v4 = vmax.f32 %v1173_v2, 0.0  ;;  %v1188_v5 = vadd.f32 %v1400_v3, %v2128_v51 }
 0x236   :  { %v1182_v6 = vpop.f32.mrf.mxu1 }
 0x237   :  { %1267 = vst [vmem:[#allocation3 + $0xc0] sm:$0xff] %v1235_v4  ;;  %v1238_v7 = vmax.f32 %v1188_v5, 0.0  ;;  %v1183_v1 = vadd.f32 %v2128_v51, %v1182_v6 }
 0x238   :  { %v1403_v8 = vpop.f32.mrf.mxu1 }
 0x239   :  { %1270 = vst [vmem:[#allocation3 + $0xd8] sm:$0xff] %v1238_v7  ;;  %v1237_v9 = vmax.f32 %v1183_v1, 0.0  ;;  %v1198_v10 = vadd.f32 %v1403_v8, %v2128_v51 }
 0x23a   :  { %v1192_v11 = vpop.f32.mrf.mxu1 }
 0x23b   :  { %1269 = vst [vmem:[#allocation3 + $0xd0] sm:$0xff] %v1237_v9  ;;  %v1240_v12 = vmax.f32 %v1198_v10, 0.0  ;;  %v1193_v13 = vadd.f32 %v2128_v51, %v1192_v11 }
 0x23c   :  { %v1406_v14 = vpop.f32.mrf.mxu1 }
 0x23d   :  { %1272 = vst [vmem:[#allocation3 + $0xe8] sm:$0xff] %v1240_v12  ;;  %v1239_v15 = vmax.f32 %v1193_v13, 0.0  ;;  %v1208_v16 = vadd.f32 %v1406_v14, %v2128_v51 }
 0x23e   :  { %v1202_v17 = vpop.f32.mrf.mxu1 }
 0x23f   :  { %1271 = vst [vmem:[#allocation3 + $0xe0] sm:$0xff] %v1239_v15  ;;  %v1242_v18 = vmax.f32 %v1208_v16, 0.0  ;;  %v1203_v19 = vadd.f32 %v2128_v51, %v1202_v17 }
 0x241   :  { %1274 = vst [vmem:[#allocation3 + $0xf8] sm:$0xff] %v1242_v18  ;;  %v1241_v20 = vmax.f32 %v1203_v19, 0.0 }
 0x243   :  { %1273 = vst [vmem:[#allocation3 + $0xf0] sm:$0xff] %v1241_v20 }
 0x244   :  { %1489 = shalt.err (!%p1486_p4)
}
 0x245   :  { %s1503_s19 = smov 128   ;;  %s1504_s20 = smov 8  }
 0x246   :  { %1286 = dma.vmem_to_hbm [thread:$0]  %s1281_s5, 4096, %s2171_s6, [#allocation4], %s1503_s19, %s1503_s19, %s1504_s20  }
 0x247   :  { %1498 = dma.done.wait [#allocation4], 4096  }
 0x248   :  { %1499 = vsyncadd [#allocation4], 4294963200 }
 0x249   :  { %1290 = vsyncpa [#allocation4], 1 }

</bundles_post_ra>
